<compile_context>
chip_gen: v7x
topology: tpu7x:2x2x1
jax: 0.10.0
libtpu: 0.0.40
codegen_flags: <defaults>
</compile_context>

<pallas_src>
import functools
import math

import jax
import jax.numpy as jnp
from jax.experimental import pallas as pl
from jax.experimental.pallas import tpu as pltpu

_LOG_SQRT_2PI = 0.9189385332046727   # log(sqrt(2*pi))
_VAR_EPS = 1e-6                       # StableLogVar var_eps
_LOG_VAR_EPS = math.log(_VAR_EPS)     # floor for log(var) (mirrors the +var_eps)


def _fused_stochastic_block_kernel(
    # inputs
    pq_ref, eps_ref, tapm_ref, rmask_ref,
    wpq_ref, bpq_ref, wo_ref, bo_ref,
    # outputs
    out_ref, z_ref, kle_ref, qmu_ref, qlv_ref, pmu_ref, plv_ref,
    klsp_ref, small_ref,
    *, H, W, Cv, TB, var_clip_max):
    HW = H * W
    THW = TB * HW

    tap_m = tapm_ref[...]                                    # (9, THW) boundary masks

    def im2col(x):
        # x: (C, THW) f32, channel-first flat.  3x3 taps are built with static lane rolls
        # plus boundary masks (roll wrap-around / cross-sample leakage only lands on
        # masked positions).  Returns (9*C, THW) bf16; taps ky-major / kx-minor, channels
        # fastest -- matches the wrapper-side weight layout.
        pieces = []
        i = 0
        for ky in range(3):
            for kx in range(3):
                d = (ky - 1) * W + (kx - 1)
                if d == 0:
                    pieces.append(x)
                else:
                    pieces.append(pltpu.roll(x, (-d) % THW, 1) * tap_m[i:i + 1, :])
                i += 1
        return jnp.concatenate(pieces, axis=0).astype(jnp.bfloat16)

    # ---- conv_in_p + conv_in_q: ONE block-diagonal matmul, channel-first result ----
    cols_pq = im2col(pq_ref[...])                            # (18*Cin, THW) bf16
    pqc = jnp.dot(wpq_ref[...], cols_pq,
                  preferred_element_type=jnp.float32) + bpq_ref[...]   # (4*Cv, THW) f32

    p_mu = pqc[0 * Cv:1 * Cv, :]
    p_lv = pqc[1 * Cv:2 * Cv, :]
    q_mu = pqc[2 * Cv:3 * Cv, :]
    q_lv = pqc[3 * Cv:4 * Cv, :]
    if var_clip_max is not None:
        p_lv = jnp.minimum(p_lv, var_clip_max)
        q_lv = jnp.minimum(q_lv, var_clip_max)

    # StableExponential variance: var = exp(lv) (lv<=0) | 1+lv (lv>0), then +var_eps.
    # log(var) is taken directly on the branches (floored at log(var_eps)); std and 1/var
    # are derived from it -> 4 EUP ops per element (2x log, 2x exp) instead of 6 and no
    # approximate reciprocal.
    # TODO(synk): this drops var_eps inside the log/std/recip -- an O(1e-6) relative
    # deviation from the torch StableLogVar, far below the accepted bf16-MXU conv error.
    def stable_log_var(lv):
        return jnp.maximum(
            jnp.where(lv > 0.0, jnp.log(1.0 + jnp.maximum(lv, 0.0)), lv),
            _LOG_VAR_EPS)

    log_qvar = stable_log_var(q_lv)
    log_pvar = stable_log_var(p_lv)
    q_std = jnp.exp(0.5 * log_qvar)
    inv_pvar = jnp.exp(-log_pvar)

    eps = eps_ref[...]                                       # (Cv, THW)
    z = q_mu + q_std * eps                                   # reparameterized z ~ q

    # log q(z): (z - q_mu)/std == eps  =>  -0.5*eps^2 - 0.5*log var_q - log sqrt(2*pi)
    logq = -0.5 * (eps * eps) - 0.5 * log_qvar - _LOG_SQRT_2PI
    dz = z - p_mu
    logp = -0.5 * (dz * dz) * inv_pvar - 0.5 * log_pvar - _LOG_SQRT_2PI
    kl = logq - logp                                         # MC elementwise KL

    kl_spatial = jnp.sum(kl, axis=0, keepdims=True)          # (1, THW) sum over channels

    # ---- per-sample reductions; static 128-aligned lane slices (no relayout) ----
    rmask = rmask_ref[...]                                   # (1, HW) interior mask
    rows = []
    for t in range(TB):
        sl = slice(t * HW, (t + 1) * HW)
        kl_t = kl[:, sl]                                     # (Cv, HW)
        klsp_t = kl_spatial[:, sl]                           # (1, HW)
        kl_chan_t = jnp.sum(kl_t, axis=1, keepdims=True)     # (Cv, 1)
        scal = jnp.concatenate(
            [jnp.sum(klsp_t).reshape(1, 1),                  # kl_samplewise
             jnp.sum(klsp_t * rmask).reshape(1, 1),          # kl_samplewise_restricted
             jnp.sum(logq[:, sl]).reshape(1, 1),             # logprob_q
             jnp.max(log_qvar[:, sl]).reshape(1, 1)],        # max log-var (see wrapper)
            axis=1)
        rows.append(jnp.concatenate([kl_chan_t.reshape(1, Cv), scal], axis=1))
    small_ref[0] = jnp.concatenate(rows, axis=0)             # (TB, Cv + 4)

    # ---- conv_out(z): same roll-based im2col, still channel-first, no scratch ----
    cols_z = im2col(z)                                       # (9*Cv, THW) bf16
    oc = jnp.dot(wo_ref[...], cols_z,
                 preferred_element_type=jnp.float32) + bo_ref[...]     # (Cout, THW)

    # ---- stores: every full-size output is lane-dense (last dim THW, mult. of 128) ----
    out_ref[...] = oc.astype(out_ref.dtype)
    z_ref[...] = z.astype(z_ref.dtype)
    kle_ref[...] = kl.astype(kle_ref.dtype)
    qmu_ref[...] = q_mu.astype(qmu_ref.dtype)
    qlv_ref[...] = q_lv.astype(qlv_ref.dtype)
    pmu_ref[...] = p_mu.astype(pmu_ref.dtype)
    plv_ref[...] = p_lv.astype(plv_ref.dtype)
    klsp_ref[...] = kl_spatial.astype(klsp_ref.dtype)


def _pick_tb(batch, max_tb=8):
    """Largest per-step sample count TB (<= max_tb) dividing `batch` while keeping the
    grid length >= 2, so ("parallel",) semantics can use both v7x TensorCores."""
    best = 1
    for tb in range(1, min(batch, max_tb) + 1):
        if batch % tb == 0 and (batch // tb >= 2 or batch == 1):
            best = tb
    return best


def _tap_masks(H, W, tb):
    """(9, tb*H*W) f32 validity masks for the 9 conv taps (zero-padding boundaries)."""
    hh, ww = jnp.meshgrid(jnp.arange(H), jnp.arange(W), indexing="ij")
    rows = []
    for ky in range(3):
        for kx in range(3):
            ok = jnp.ones((H, W), bool)
            if ky == 0:
                ok = ok & (hh > 0)
            if ky == 2:
                ok = ok & (hh < H - 1)
            if kx == 0:
                ok = ok & (ww > 0)
            if kx == 2:
                ok = ok & (ww < W - 1)
            rows.append(ok.reshape(1, H * W))
    return jnp.tile(jnp.concatenate(rows, axis=0).astype(jnp.float32), (1, tb))


def normal_stochastic_block_forward(p_params, q_params, eps, params, vanilla_latent_hw,
                                    var_clip_max=None, store_dtype=jnp.float32, tb=None):
    """NCHW forward of NormalStochasticBlock (q_params given, mode_pred=False,
    analytical_kl=False, forced_latent=None, force_constant_output=False).

    Weights are HWIO (3,3,Cin,Cout); convert from torch OIHW with w.transpose(2,3,1,0).
    store_dtype=jnp.bfloat16 halves HBM writeback for the 7 full-size outputs (biggest win
    on v5e/v6e bandwidth) if downstream tolerates it.
    """
    (w_p, b_p, w_q, b_q, w_o, b_o) = params
    B, Cin, H, W = p_params.shape
    Cv = w_p.shape[-1] // 2
    Cout = w_o.shape[-1]
    HW = H * W

    # TODO(synk): odd-width center-crop (F.center_crop) and p->q spatial-size matching are
    # skipped; example shapes are even and p/q spatial sizes already match.
    # TODO(synk): for real LVAE latent sizes add a spatial row-tile grid axis (with halo
    # masks) and re-derive the per-step VMEM budget per chip (v7x: 64 MiB physical /
    # 32 MiB scoped-default VMEM vs 128 MiB on v5e/v6e); at these sizes one batch-group
    # block fits comfortably, so vmem_limit_bytes is left at the default.
    assert HW % 128 == 0, "lane-dense channel-first layout assumes H*W % 128 == 0"

    if tb is None:
        tb = _pick_tb(B)
    assert B % tb == 0
    grid_len = B // tb
    THW = tb * HW

    # ---- channel-first flattened (lane-dense) inputs ----
    def to_cf(x, c):
        return jnp.transpose(x.astype(jnp.float32), (1, 0, 2, 3)).reshape(c, B * HW)

    pq_cf = jnp.concatenate([to_cf(p_params, Cin), to_cf(q_params, Cin)], axis=0)
    eps_cf = to_cf(eps, Cv)
    tap_m = _tap_masks(H, W, tb)

    # ---- weights in channel-first matmul orientation (Cout, 9*Cin); p/q convs fused as a
    # block-diagonal (4*Cv, 18*Cin) so both run in one MXU matmul ----
    def w_cf(w):                        # HWIO (3,3,ci,co) -> (co, 9, ci)
        return jnp.transpose(w, (3, 0, 1, 2)).reshape(w.shape[3], 9, w.shape[2])

    wp_t, wq_t = w_cf(w_p), w_cf(w_q)
    zblk = jnp.zeros_like(wp_t)
    wpq = jnp.concatenate(
        [jnp.concatenate([wp_t, zblk], axis=2),
         jnp.concatenate([zblk, wq_t], axis=2)], axis=0
    ).reshape(4 * Cv, 18 * Cin).astype(jnp.bfloat16)
    bpq = jnp.concatenate([b_p, b_q]).reshape(4 * Cv, 1).astype(jnp.float32)
    wo_m = w_cf(w_o).reshape(Cout, 9 * Cv).astype(jnp.bfloat16)
    bo_m = b_o.reshape(Cout, 1).astype(jnp.float32)

    # ---- interior mask for the restricted KL (pad from last spatial dim, both dims) ----
    pad = (W - vanilla_latent_hw) // 2
    if pad > 0:
        idx = jnp.arange(HW, dtype=jnp.int32)
        hh, ww = idx // W, idx % W
        inside = (hh >= pad) & (hh < H - pad) & (ww >= pad) & (ww < W - pad)
        restr_mask = inside.astype(jnp.float32).reshape(1, HW)
    else:
        restr_mask = jnp.ones((1, HW), jnp.float32)

    kernel = functools.partial(_fused_stochastic_block_kernel,
                               H=H, W=W, Cv=Cv, TB=tb, var_clip_max=var_clip_max)

    cf_blk = lambda g: (0, g)        # channel-first arrays: block along flattened B*HW
    fixed = lambda g: (0, 0)

    out_shapes = (
        jax.ShapeDtypeStruct((Cout, B * HW), store_dtype),          # out = conv_out(z)
        jax.ShapeDtypeStruct((Cv, B * HW), store_dtype),            # z
        jax.ShapeDtypeStruct((Cv, B * HW), store_dtype),            # kl_elementwise
        jax.ShapeDtypeStruct((Cv, B * HW), store_dtype),            # q_mu
        jax.ShapeDtypeStruct((Cv, B * HW), store_dtype),            # q_lv (clipped logvar)
        jax.ShapeDtypeStruct((Cv, B * HW), store_dtype),            # p_mu
        jax.ShapeDtypeStruct((Cv, B * HW), store_dtype),            # p_lv (clipped logvar)
        jax.ShapeDtypeStruct((1, B * HW), jnp.float32),             # kl_spatial
        jax.ShapeDtypeStruct((grid_len, tb, Cv + 4), jnp.float32),  # per-sample scalars
    )
    in_specs = [
        pl.BlockSpec((2 * Cin, THW), cf_blk),        # stacked p/q input (channel-first)
        pl.BlockSpec((Cv, THW), cf_blk),             # eps
        pl.BlockSpec((9, THW), fixed),               # conv boundary tap masks
        pl.BlockSpec((1, HW), fixed),                # restricted-KL interior mask
        pl.BlockSpec((4 * Cv, 18 * Cin), fixed),     # fused block-diag conv_in weight
        pl.BlockSpec((4 * Cv, 1), fixed),            # fused conv_in bias
        pl.BlockSpec((Cout, 9 * Cv), fixed),         # conv_out weight
        pl.BlockSpec((Cout, 1), fixed),              # conv_out bias
    ]
    out_specs = (
        pl.BlockSpec((Cout, THW), cf_blk),
        pl.BlockSpec((Cv, THW), cf_blk),
        pl.BlockSpec((Cv, THW), cf_blk),
        pl.BlockSpec((Cv, THW), cf_blk),
        pl.BlockSpec((Cv, THW), cf_blk),
        pl.BlockSpec((Cv, THW), cf_blk),
        pl.BlockSpec((Cv, THW), cf_blk),
        pl.BlockSpec((1, THW), cf_blk),
        pl.BlockSpec((1, tb, Cv + 4), lambda g: (g, 0, 0)),
    )

    # Advisory cost hint so XLA schedules the surrounding layout plumbing around the call.
    out_isz = jnp.dtype(store_dtype).itemsize
    flops = 2 * B * HW * (4 * Cv * 18 * Cin + Cout * 9 * Cv) + 40 * B * Cv * HW
    transcendentals = 4 * B * Cv * HW
    bytes_accessed = (
        4 * (pq_cf.size + eps_cf.size + tap_m.size + restr_mask.size
             + bpq.size + bo_m.size)
        + 2 * (wpq.size + wo_m.size)
        + out_isz * (Cout + 6 * Cv) * B * HW
        + 4 * (B * HW + B * (Cv + 4)))
    cost = pl.CostEstimate(flops=int(flops), transcendentals=int(transcendentals),
                           bytes_accessed=int(bytes_accessed))

    (out_f, z_f, kle_f, qmu_f, qlv_f, pmu_f, plv_f, klsp_f, small) = pl.pallas_call(
        kernel,
        out_shape=out_shapes,
        grid=(grid_len,),
        in_specs=in_specs,
        out_specs=out_specs,
        compiler_params=pltpu.CompilerParams(dimension_semantics=("parallel",)),
        cost_estimate=cost,
    )(pq_cf, eps_cf, tap_m, restr_mask, wpq, bpq, wo_m, bo_m)

    def from_cf(x, c):               # (C, B*HW) -> (B, C, H, W)
        return jnp.transpose(x.reshape(c, B, H, W), (1, 0, 2, 3))

    small = small.reshape(B, Cv + 4)
    out = from_cf(out_f, Cout)
    data = {
        "kl_elementwise": from_cf(kle_f, Cv),
        "kl_samplewise": small[:, Cv],
        "kl_samplewise_restricted": small[:, Cv + 1],
        "kl_spatial": klsp_f.reshape(B, H, W),
        "kl_channelwise": small[:, :Cv],
        "z": from_cf(z_f, Cv),
        # raw (clipped) mu / logvar tensors (torch wraps these in StableMean/StableLogVar)
        "p_params": (from_cf(pmu_f, Cv), from_cf(plv_f, Cv)),
        "q_params": (from_cf(qmu_f, Cv), from_cf(qlv_f, Cv)),
        "logprob_q": small[:, Cv + 2],
        # torch: qvar_max = max(StableLogVar.get()) = max over log(var_q).  Apply jnp.exp
        # here if a variance-scale value is needed (the argmax is identical either way).
        "qvar_max": jnp.max(small[:, Cv + 3]),
    }
    return out, data


# -----------------------------------------------------------------------------
# Example run
# -----------------------------------------------------------------------------
if __name__ == "__main__":
    key = jax.random.PRNGKey(0)
    B, C_IN, C_VARS, C_OUT, H, W = 2, 4, 4, 4, 16, 16
    VANILLA_LATENT_HW = 8  # -> restricted-KL crop pad = 4

    keys = jax.random.split(key, 6)

    def conv_init(k, cin, cout):
        kw, kb = jax.random.split(k)
        fan_in = 9 * cin
        w = jax.random.normal(kw, (3, 3, cin, cout), jnp.float32) / jnp.sqrt(fan_in)
        b = 0.01 * jax.random.normal(kb, (cout,), jnp.float32)
        return w, b

    w_p, b_p = conv_init(keys[0], C_IN, 2 * C_VARS)   # conv_in_p
    w_q, b_q = conv_init(keys[1], C_IN, 2 * C_VARS)   # conv_in_q
    w_o, b_o = conv_init(keys[2], C_VARS, C_OUT)      # conv_out
    params = (w_p, b_p, w_q, b_q, w_o, b_o)

    p_params = jax.random.normal(keys[3], (B, C_IN, H, W), jnp.float32)
    q_params = jax.random.normal(keys[4], (B, C_IN, H, W), jnp.float32)
    eps = jax.random.normal(keys[5], (B, C_VARS, H, W), jnp.float32)

    out, data = normal_stochastic_block_forward(
        p_params, q_params, eps, params, vanilla_latent_hw=VANILLA_LATENT_HW)
    jax.block_until_ready(out)
    jax.block_until_ready(data["kl_samplewise"])

    assert out.shape == (B, C_OUT, H, W)
    assert data["z"].shape == (B, C_VARS, H, W)
    assert data["kl_elementwise"].shape == (B, C_VARS, H, W)
    assert data["kl_samplewise"].shape == (B,)
    assert data["kl_samplewise_restricted"].shape == (B,)
    assert data["kl_channelwise"].shape == (B, C_VARS)
    assert data["kl_spatial"].shape == (B, H, W)
    assert data["logprob_q"].shape == (B,)
    assert bool(jnp.all(jnp.isfinite(out)))
    assert bool(jnp.all(jnp.isfinite(data["kl_elementwise"])))
    assert bool(jnp.all(jnp.isfinite(data["kl_samplewise"])))
    assert bool(jnp.all(jnp.isfinite(data["kl_spatial"])))

    print("KERNEL_OK")
</pallas_src>

<mosaic_0001>
module attributes {stable_mosaic.version = 11 : i64} {
  func.func @_fused_stochastic_block_kernel(%arg0: i32, %arg1: memref<8x256xf32, #tpu.memory_space<vmem>>, %arg2: memref<4x256xf32, #tpu.memory_space<vmem>>, %arg3: memref<9x256xf32, #tpu.memory_space<vmem>>, %arg4: memref<1x256xf32, #tpu.memory_space<vmem>>, %arg5: memref<16x72xbf16, #tpu.memory_space<vmem>>, %arg6: memref<16x1xf32, #tpu.memory_space<vmem>>, %arg7: memref<4x36xbf16, #tpu.memory_space<vmem>>, %arg8: memref<4x1xf32, #tpu.memory_space<vmem>>, %arg9: memref<4x256xf32, #tpu.memory_space<vmem>>, %arg10: memref<4x256xf32, #tpu.memory_space<vmem>>, %arg11: memref<4x256xf32, #tpu.memory_space<vmem>>, %arg12: memref<4x256xf32, #tpu.memory_space<vmem>>, %arg13: memref<4x256xf32, #tpu.memory_space<vmem>>, %arg14: memref<4x256xf32, #tpu.memory_space<vmem>>, %arg15: memref<4x256xf32, #tpu.memory_space<vmem>>, %arg16: memref<1x256xf32, #tpu.memory_space<vmem>>, %arg17: memref<1x1x8xf32, #tpu.memory_space<vmem>>) attributes {dimension_semantics = [#tpu.dimension_semantics<parallel>], iteration_bounds = array<i64: 2>, scalar_prefetch = 0 : i64, scratch_operands = 0 : i64, tpu.core_type = #tpu.core_type<tc>, window_params = [{transform_indices = @transform_0, window_bounds = array<i64: 8, 256>}, {transform_indices = @transform_1, window_bounds = array<i64: 4, 256>}, {pipeline_mode = #tpu.pipeline_mode<synchronous>, transform_indices = @transform_2, window_bounds = array<i64: 9, 256>}, {pipeline_mode = #tpu.pipeline_mode<synchronous>, transform_indices = @transform_3, window_bounds = array<i64: 1, 256>}, {pipeline_mode = #tpu.pipeline_mode<synchronous>, transform_indices = @transform_4, window_bounds = array<i64: 16, 72>}, {pipeline_mode = #tpu.pipeline_mode<synchronous>, transform_indices = @transform_5, window_bounds = array<i64: 16, 1>}, {pipeline_mode = #tpu.pipeline_mode<synchronous>, transform_indices = @transform_6, window_bounds = array<i64: 4, 36>}, {pipeline_mode = #tpu.pipeline_mode<synchronous>, transform_indices = @transform_7, window_bounds = array<i64: 4, 1>}, {transform_indices = @transform_8, window_bounds = array<i64: 4, 256>}, {transform_indices = @transform_9, window_bounds = array<i64: 4, 256>}, {transform_indices = @transform_10, window_bounds = array<i64: 4, 256>}, {transform_indices = @transform_11, window_bounds = array<i64: 4, 256>}, {transform_indices = @transform_12, window_bounds = array<i64: 4, 256>}, {transform_indices = @transform_13, window_bounds = array<i64: 4, 256>}, {transform_indices = @transform_14, window_bounds = array<i64: 4, 256>}, {transform_indices = @transform_15, window_bounds = array<i64: 1, 256>}, {transform_indices = @transform_16, window_bounds = array<i64: 1, 1, 8>}]} {
    %c0 = arith.constant 0 : index
    %c0_0 = arith.constant 0 : index
    %0 = vector.load %arg3[%c0, %c0_0] : memref<9x256xf32, #tpu.memory_space<vmem>>, vector<9x256xf32>
    %c0_1 = arith.constant 0 : index
    %c0_2 = arith.constant 0 : index
    %1 = vector.load %arg1[%c0_1, %c0_2] : memref<8x256xf32, #tpu.memory_space<vmem>>, vector<8x256xf32>
    %c17_i32 = arith.constant 17 : i32
    %2 = tpu.dynamic_rotate %1 by %c17_i32 dim 1 : vector<8x256xf32>, i32 -> vector<8x256xf32>
    %3 = vector.extract_strided_slice %0 {offsets = [0, 0], sizes = [1, 256], strides = [1, 1]} : vector<9x256xf32> to vector<1x256xf32>
    %4 = vector.broadcast %3 : vector<1x256xf32> to vector<8x256xf32>
    %5 = arith.mulf %2, %4 : vector<8x256xf32>
    %c16_i32 = arith.constant 16 : i32
    %6 = tpu.dynamic_rotate %1 by %c16_i32 dim 1 : vector<8x256xf32>, i32 -> vector<8x256xf32>
    %7 = vector.extract_strided_slice %0 {offsets = [1, 0], sizes = [1, 256], strides = [1, 1]} : vector<9x256xf32> to vector<1x256xf32>
    %8 = vector.broadcast %7 : vector<1x256xf32> to vector<8x256xf32>
    %9 = arith.mulf %6, %8 : vector<8x256xf32>
    %c15_i32 = arith.constant 15 : i32
    %10 = tpu.dynamic_rotate %1 by %c15_i32 dim 1 : vector<8x256xf32>, i32 -> vector<8x256xf32>
    %11 = vector.extract_strided_slice %0 {offsets = [2, 0], sizes = [1, 256], strides = [1, 1]} : vector<9x256xf32> to vector<1x256xf32>
    %12 = vector.broadcast %11 : vector<1x256xf32> to vector<8x256xf32>
    %13 = arith.mulf %10, %12 : vector<8x256xf32>
    %c1_i32 = arith.constant 1 : i32
    %14 = tpu.dynamic_rotate %1 by %c1_i32 dim 1 : vector<8x256xf32>, i32 -> vector<8x256xf32>
    %15 = vector.extract_strided_slice %0 {offsets = [3, 0], sizes = [1, 256], strides = [1, 1]} : vector<9x256xf32> to vector<1x256xf32>
    %16 = vector.broadcast %15 : vector<1x256xf32> to vector<8x256xf32>
    %17 = arith.mulf %14, %16 : vector<8x256xf32>
    %c255_i32 = arith.constant 255 : i32
    %18 = tpu.dynamic_rotate %1 by %c255_i32 dim 1 : vector<8x256xf32>, i32 -> vector<8x256xf32>
    %19 = vector.extract_strided_slice %0 {offsets = [5, 0], sizes = [1, 256], strides = [1, 1]} : vector<9x256xf32> to vector<1x256xf32>
    %20 = vector.broadcast %19 : vector<1x256xf32> to vector<8x256xf32>
    %21 = arith.mulf %18, %20 : vector<8x256xf32>
    %c241_i32 = arith.constant 241 : i32
    %22 = tpu.dynamic_rotate %1 by %c241_i32 dim 1 : vector<8x256xf32>, i32 -> vector<8x256xf32>
    %23 = vector.extract_strided_slice %0 {offsets = [6, 0], sizes = [1, 256], strides = [1, 1]} : vector<9x256xf32> to vector<1x256xf32>
    %24 = vector.broadcast %23 : vector<1x256xf32> to vector<8x256xf32>
    %25 = arith.mulf %22, %24 : vector<8x256xf32>
    %c240_i32 = arith.constant 240 : i32
    %26 = tpu.dynamic_rotate %1 by %c240_i32 dim 1 : vector<8x256xf32>, i32 -> vector<8x256xf32>
    %27 = vector.extract_strided_slice %0 {offsets = [7, 0], sizes = [1, 256], strides = [1, 1]} : vector<9x256xf32> to vector<1x256xf32>
    %28 = vector.broadcast %27 : vector<1x256xf32> to vector<8x256xf32>
    %29 = arith.mulf %26, %28 : vector<8x256xf32>
    %c239_i32 = arith.constant 239 : i32
    %30 = tpu.dynamic_rotate %1 by %c239_i32 dim 1 : vector<8x256xf32>, i32 -> vector<8x256xf32>
    %31 = vector.extract_strided_slice %0 {offsets = [8, 0], sizes = [1, 256], strides = [1, 1]} : vector<9x256xf32> to vector<1x256xf32>
    %32 = vector.broadcast %31 : vector<1x256xf32> to vector<8x256xf32>
    %33 = arith.mulf %30, %32 : vector<8x256xf32>
    %34 = tpu.concatenate %5, %9, %13, %17, %1, %21, %25, %29, %33 in 0 : vector<8x256xf32>, vector<8x256xf32>, vector<8x256xf32>, vector<8x256xf32>, vector<8x256xf32>, vector<8x256xf32>, vector<8x256xf32>, vector<8x256xf32>, vector<8x256xf32> -> vector<72x256xf32>
    %35 = arith.truncf %34 : vector<72x256xf32> to vector<72x256xbf16>
    %c0_3 = arith.constant 0 : index
    %c0_4 = arith.constant 0 : index
    %36 = vector.load %arg5[%c0_3, %c0_4] : memref<16x72xbf16, #tpu.memory_space<vmem>>, vector<16x72xbf16>
    %cst = arith.constant dense<0.000000e+00> : vector<16x256xf32>
    %37 = tpu.matmul %36, %35, %cst {dimension_numbers = #tpu.dot_dimension_numbers<[1], [0], [0], [1], [0, 0, 1, 1], [], []>} : vector<16x72xbf16>, vector<72x256xbf16>, vector<16x256xf32> -> vector<16x256xf32>
    %c0_5 = arith.constant 0 : index
    %c0_6 = arith.constant 0 : index
    %38 = vector.load %arg6[%c0_5, %c0_6] : memref<16x1xf32, #tpu.memory_space<vmem>>, vector<16x1xf32>
    %39 = vector.broadcast %38 : vector<16x1xf32> to vector<16x256xf32>
    %40 = arith.addf %37, %39 : vector<16x256xf32>
    %41 = vector.extract_strided_slice %40 {offsets = [0, 0], sizes = [4, 256], strides = [1, 1]} : vector<16x256xf32> to vector<4x256xf32>
    %42 = vector.extract_strided_slice %40 {offsets = [4, 0], sizes = [4, 256], strides = [1, 1]} : vector<16x256xf32> to vector<4x256xf32>
    %43 = vector.extract_strided_slice %40 {offsets = [8, 0], sizes = [4, 256], strides = [1, 1]} : vector<16x256xf32> to vector<4x256xf32>
    %44 = vector.extract_strided_slice %40 {offsets = [12, 0], sizes = [4, 256], strides = [1, 1]} : vector<16x256xf32> to vector<4x256xf32>
    %cst_7 = arith.constant 0.000000e+00 : f32
    %45 = vector.broadcast %cst_7 : f32 to vector<4x256xf32>
    %46 = arith.cmpf ogt, %44, %45 : vector<4x256xf32>
    %cst_8 = arith.constant 0.000000e+00 : f32
    %47 = vector.broadcast %cst_8 : f32 to vector<4x256xf32>
    %48 = arith.maximumf %44, %47 : vector<4x256xf32>
    %cst_9 = arith.constant 1.000000e+00 : f32
    %49 = vector.broadcast %cst_9 : f32 to vector<4x256xf32>
    %50 = arith.addf %49, %48 : vector<4x256xf32>
    %51 = math.log %50 : vector<4x256xf32>
    %52 = arith.select %46, %51, %44 : vector<4x256xi1>, vector<4x256xf32>
    %cst_10 = arith.constant -13.8155107 : f32
    %53 = vector.broadcast %cst_10 : f32 to vector<4x256xf32>
    %54 = arith.maximumf %52, %53 : vector<4x256xf32>
    %cst_11 = arith.constant 0.000000e+00 : f32
    %55 = vector.broadcast %cst_11 : f32 to vector<4x256xf32>
    %56 = arith.cmpf ogt, %42, %55 : vector<4x256xf32>
    %cst_12 = arith.constant 0.000000e+00 : f32
    %57 = vector.broadcast %cst_12 : f32 to vector<4x256xf32>
    %58 = arith.maximumf %42, %57 : vector<4x256xf32>
    %cst_13 = arith.constant 1.000000e+00 : f32
    %59 = vector.broadcast %cst_13 : f32 to vector<4x256xf32>
    %60 = arith.addf %59, %58 : vector<4x256xf32>
    %61 = math.log %60 : vector<4x256xf32>
    %62 = arith.select %56, %61, %42 : vector<4x256xi1>, vector<4x256xf32>
    %cst_14 = arith.constant -13.8155107 : f32
    %63 = vector.broadcast %cst_14 : f32 to vector<4x256xf32>
    %64 = arith.maximumf %62, %63 : vector<4x256xf32>
    %cst_15 = arith.constant 5.000000e-01 : f32
    %65 = vector.broadcast %cst_15 : f32 to vector<4x256xf32>
    %66 = arith.mulf %65, %54 : vector<4x256xf32>
    %67 = math.exp %66 : vector<4x256xf32>
    %cst_16 = arith.constant 0.000000e+00 : f32
    %68 = vector.broadcast %cst_16 : f32 to vector<4x256xf32>
    %69 = arith.subf %68, %64 : vector<4x256xf32>
    %70 = math.exp %69 : vector<4x256xf32>
    %c0_17 = arith.constant 0 : index
    %c0_18 = arith.constant 0 : index
    %71 = vector.load %arg2[%c0_17, %c0_18] : memref<4x256xf32, #tpu.memory_space<vmem>>, vector<4x256xf32>
    %72 = arith.mulf %67, %71 : vector<4x256xf32>
    %73 = arith.addf %43, %72 : vector<4x256xf32>
    %74 = arith.mulf %71, %71 : vector<4x256xf32>
    %cst_19 = arith.constant -5.000000e-01 : f32
    %75 = vector.broadcast %cst_19 : f32 to vector<4x256xf32>
    %76 = arith.mulf %75, %74 : vector<4x256xf32>
    %cst_20 = arith.constant 5.000000e-01 : f32
    %77 = vector.broadcast %cst_20 : f32 to vector<4x256xf32>
    %78 = arith.mulf %77, %54 : vector<4x256xf32>
    %79 = arith.subf %76, %78 : vector<4x256xf32>
    %cst_21 = arith.constant 0.918938517 : f32
    %80 = vector.broadcast %cst_21 : f32 to vector<4x256xf32>
    %81 = arith.subf %79, %80 : vector<4x256xf32>
    %82 = arith.subf %73, %41 : vector<4x256xf32>
    %83 = arith.mulf %82, %82 : vector<4x256xf32>
    %cst_22 = arith.constant -5.000000e-01 : f32
    %84 = vector.broadcast %cst_22 : f32 to vector<4x256xf32>
    %85 = arith.mulf %84, %83 : vector<4x256xf32>
    %86 = arith.mulf %85, %70 : vector<4x256xf32>
    %cst_23 = arith.constant 5.000000e-01 : f32
    %87 = vector.broadcast %cst_23 : f32 to vector<4x256xf32>
    %88 = arith.mulf %87, %64 : vector<4x256xf32>
    %89 = arith.subf %86, %88 : vector<4x256xf32>
    %cst_24 = arith.constant 0.918938517 : f32
    %90 = vector.broadcast %cst_24 : f32 to vector<4x256xf32>
    %91 = arith.subf %89, %90 : vector<4x256xf32>
    %92 = arith.subf %81, %91 : vector<4x256xf32>
    %cst_25 = arith.constant dense<0.000000e+00> : vector<256xf32>
    %93 = vector.multi_reduction <add>, %92, %cst_25 [0] : vector<4x256xf32> to vector<256xf32>
    %94 = vector.shape_cast %93 : vector<256xf32> to vector<1x256xf32>
    %c0_26 = arith.constant 0 : index
    %c0_27 = arith.constant 0 : index
    %95 = vector.load %arg4[%c0_26, %c0_27] : memref<1x256xf32, #tpu.memory_space<vmem>>, vector<1x256xf32>
    %cst_28 = arith.constant dense<0.000000e+00> : vector<4xf32>
    %96 = vector.multi_reduction <add>, %92, %cst_28 [1] : vector<4x256xf32> to vector<4xf32>
    %97 = vector.shape_cast %96 : vector<4xf32> to vector<4x1xf32>
    %98 = vector.shape_cast %94 : vector<1x256xf32> to vector<1x1x256xf32>
    %cst_29 = arith.constant dense<0.000000e+00> : vector<1xf32>
    %99 = vector.multi_reduction <add>, %98, %cst_29 [1, 2] : vector<1x1x256xf32> to vector<1xf32>
    %100 = vector.shape_cast %99 : vector<1xf32> to vector<1x1x1xf32>
    %101 = vector.extract %100[0, 0, 0] : f32 from vector<1x1x1xf32>
    %102 = vector.broadcast %101 : f32 to vector<1x1xf32>
    %103 = arith.mulf %94, %95 : vector<1x256xf32>
    %104 = vector.shape_cast %103 : vector<1x256xf32> to vector<1x1x256xf32>
    %cst_30 = arith.constant dense<0.000000e+00> : vector<1xf32>
    %105 = vector.multi_reduction <add>, %104, %cst_30 [1, 2] : vector<1x1x256xf32> to vector<1xf32>
    %106 = vector.shape_cast %105 : vector<1xf32> to vector<1x1x1xf32>
    %107 = vector.extract %106[0, 0, 0] : f32 from vector<1x1x1xf32>
    %108 = vector.broadcast %107 : f32 to vector<1x1xf32>
    %109 = vector.shape_cast %81 : vector<4x256xf32> to vector<1x4x256xf32>
    %cst_31 = arith.constant dense<0.000000e+00> : vector<1xf32>
    %110 = vector.multi_reduction <add>, %109, %cst_31 [1, 2] : vector<1x4x256xf32> to vector<1xf32>
    %111 = vector.shape_cast %110 : vector<1xf32> to vector<1x1x1xf32>
    %112 = vector.extract %111[0, 0, 0] : f32 from vector<1x1x1xf32>
    %113 = vector.broadcast %112 : f32 to vector<1x1xf32>
    %114 = vector.shape_cast %54 : vector<4x256xf32> to vector<1x4x256xf32>
    %cst_32 = arith.constant dense<0xFF800000> : vector<1xf32>
    %115 = vector.multi_reduction <maximumf>, %114, %cst_32 [1, 2] : vector<1x4x256xf32> to vector<1xf32>
    %116 = vector.shape_cast %115 : vector<1xf32> to vector<1x1x1xf32>
    %117 = vector.extract %116[0, 0, 0] : f32 from vector<1x1x1xf32>
    %118 = vector.broadcast %117 : f32 to vector<1x1xf32>
    %119 = tpu.concatenate %102, %108, %113, %118 in 1 : vector<1x1xf32>, vector<1x1xf32>, vector<1x1xf32>, vector<1x1xf32> -> vector<1x4xf32>
    %120 = vector.shape_cast %97 : vector<4x1xf32> to vector<1x4xf32>
    %121 = tpu.concatenate %120, %119 in 1 : vector<1x4xf32>, vector<1x4xf32> -> vector<1x8xf32>
    %c0_33 = arith.constant 0 : index
    %c0_34 = arith.constant 0 : index
    %c0_35 = arith.constant 0 : index
    %122 = vector.load %arg17[%c0_33, %c0_34, %c0_35] : memref<1x1x8xf32, #tpu.memory_space<vmem>>, vector<1x1x8xf32>
    %123 = vector.shape_cast %122 : vector<1x1x8xf32> to vector<1x8xf32>
    %124 = vector.shape_cast %121 : vector<1x8xf32> to vector<1x1x8xf32>
    tpu.vector_store %arg17[%c0_33, %c0_34, %c0_35], %124 {strides = array<i32>} : memref<1x1x8xf32, #tpu.memory_space<vmem>>, vector<1x1x8xf32>,
    %c17_i32_36 = arith.constant 17 : i32
    %125 = tpu.dynamic_rotate %73 by %c17_i32_36 dim 1 : vector<4x256xf32>, i32 -> vector<4x256xf32>
    %126 = vector.extract_strided_slice %0 {offsets = [0, 0], sizes = [1, 256], strides = [1, 1]} : vector<9x256xf32> to vector<1x256xf32>
    %127 = vector.broadcast %126 : vector<1x256xf32> to vector<4x256xf32>
    %128 = arith.mulf %125, %127 : vector<4x256xf32>
    %c16_i32_37 = arith.constant 16 : i32
    %129 = tpu.dynamic_rotate %73 by %c16_i32_37 dim 1 : vector<4x256xf32>, i32 -> vector<4x256xf32>
    %130 = vector.extract_strided_slice %0 {offsets = [1, 0], sizes = [1, 256], strides = [1, 1]} : vector<9x256xf32> to vector<1x256xf32>
    %131 = vector.broadcast %130 : vector<1x256xf32> to vector<4x256xf32>
    %132 = arith.mulf %129, %131 : vector<4x256xf32>
    %c15_i32_38 = arith.constant 15 : i32
    %133 = tpu.dynamic_rotate %73 by %c15_i32_38 dim 1 : vector<4x256xf32>, i32 -> vector<4x256xf32>
    %134 = vector.extract_strided_slice %0 {offsets = [2, 0], sizes = [1, 256], strides = [1, 1]} : vector<9x256xf32> to vector<1x256xf32>
    %135 = vector.broadcast %134 : vector<1x256xf32> to vector<4x256xf32>
    %136 = arith.mulf %133, %135 : vector<4x256xf32>
    %c1_i32_39 = arith.constant 1 : i32
    %137 = tpu.dynamic_rotate %73 by %c1_i32_39 dim 1 : vector<4x256xf32>, i32 -> vector<4x256xf32>
    %138 = vector.extract_strided_slice %0 {offsets = [3, 0], sizes = [1, 256], strides = [1, 1]} : vector<9x256xf32> to vector<1x256xf32>
    %139 = vector.broadcast %138 : vector<1x256xf32> to vector<4x256xf32>
    %140 = arith.mulf %137, %139 : vector<4x256xf32>
    %c255_i32_40 = arith.constant 255 : i32
    %141 = tpu.dynamic_rotate %73 by %c255_i32_40 dim 1 : vector<4x256xf32>, i32 -> vector<4x256xf32>
    %142 = vector.extract_strided_slice %0 {offsets = [5, 0], sizes = [1, 256], strides = [1, 1]} : vector<9x256xf32> to vector<1x256xf32>
    %143 = vector.broadcast %142 : vector<1x256xf32> to vector<4x256xf32>
    %144 = arith.mulf %141, %143 : vector<4x256xf32>
    %c241_i32_41 = arith.constant 241 : i32
    %145 = tpu.dynamic_rotate %73 by %c241_i32_41 dim 1 : vector<4x256xf32>, i32 -> vector<4x256xf32>
    %146 = vector.extract_strided_slice %0 {offsets = [6, 0], sizes = [1, 256], strides = [1, 1]} : vector<9x256xf32> to vector<1x256xf32>
    %147 = vector.broadcast %146 : vector<1x256xf32> to vector<4x256xf32>
    %148 = arith.mulf %145, %147 : vector<4x256xf32>
    %c240_i32_42 = arith.constant 240 : i32
    %149 = tpu.dynamic_rotate %73 by %c240_i32_42 dim 1 : vector<4x256xf32>, i32 -> vector<4x256xf32>
    %150 = vector.extract_strided_slice %0 {offsets = [7, 0], sizes = [1, 256], strides = [1, 1]} : vector<9x256xf32> to vector<1x256xf32>
    %151 = vector.broadcast %150 : vector<1x256xf32> to vector<4x256xf32>
    %152 = arith.mulf %149, %151 : vector<4x256xf32>
    %c239_i32_43 = arith.constant 239 : i32
    %153 = tpu.dynamic_rotate %73 by %c239_i32_43 dim 1 : vector<4x256xf32>, i32 -> vector<4x256xf32>
    %154 = vector.extract_strided_slice %0 {offsets = [8, 0], sizes = [1, 256], strides = [1, 1]} : vector<9x256xf32> to vector<1x256xf32>
    %155 = vector.broadcast %154 : vector<1x256xf32> to vector<4x256xf32>
    %156 = arith.mulf %153, %155 : vector<4x256xf32>
    %157 = tpu.concatenate %128, %132, %136, %140, %73, %144, %148, %152, %156 in 0 : vector<4x256xf32>, vector<4x256xf32>, vector<4x256xf32>, vector<4x256xf32>, vector<4x256xf32>, vector<4x256xf32>, vector<4x256xf32>, vector<4x256xf32>, vector<4x256xf32> -> vector<36x256xf32>
    %158 = arith.truncf %157 : vector<36x256xf32> to vector<36x256xbf16>
    %c0_44 = arith.constant 0 : index
    %c0_45 = arith.constant 0 : index
    %159 = vector.load %arg7[%c0_44, %c0_45] : memref<4x36xbf16, #tpu.memory_space<vmem>>, vector<4x36xbf16>
    %cst_46 = arith.constant dense<0.000000e+00> : vector<4x256xf32>
    %160 = tpu.matmul %159, %158, %cst_46 {dimension_numbers = #tpu.dot_dimension_numbers<[1], [0], [0], [1], [0, 0, 1, 1], [], []>} : vector<4x36xbf16>, vector<36x256xbf16>, vector<4x256xf32> -> vector<4x256xf32>
    %c0_47 = arith.constant 0 : index
    %c0_48 = arith.constant 0 : index
    %161 = vector.load %arg8[%c0_47, %c0_48] : memref<4x1xf32, #tpu.memory_space<vmem>>, vector<4x1xf32>
    %162 = vector.broadcast %161 : vector<4x1xf32> to vector<4x256xf32>
    %163 = arith.addf %160, %162 : vector<4x256xf32>
    %c0_49 = arith.constant 0 : index
    %c0_50 = arith.constant 0 : index
    %164 = vector.load %arg9[%c0_49, %c0_50] : memref<4x256xf32, #tpu.memory_space<vmem>>, vector<4x256xf32>
    tpu.vector_store %arg9[%c0_49, %c0_50], %163 {strides = array<i32>} : memref<4x256xf32, #tpu.memory_space<vmem>>, vector<4x256xf32>,
    %c0_51 = arith.constant 0 : index
    %c0_52 = arith.constant 0 : index
    %165 = vector.load %arg10[%c0_51, %c0_52] : memref<4x256xf32, #tpu.memory_space<vmem>>, vector<4x256xf32>
    tpu.vector_store %arg10[%c0_51, %c0_52], %73 {strides = array<i32>} : memref<4x256xf32, #tpu.memory_space<vmem>>, vector<4x256xf32>,
    %c0_53 = arith.constant 0 : index
    %c0_54 = arith.constant 0 : index
    %166 = vector.load %arg11[%c0_53, %c0_54] : memref<4x256xf32, #tpu.memory_space<vmem>>, vector<4x256xf32>
    tpu.vector_store %arg11[%c0_53, %c0_54], %92 {strides = array<i32>} : memref<4x256xf32, #tpu.memory_space<vmem>>, vector<4x256xf32>,
    %c0_55 = arith.constant 0 : index
    %c0_56 = arith.constant 0 : index
    %167 = vector.load %arg12[%c0_55, %c0_56] : memref<4x256xf32, #tpu.memory_space<vmem>>, vector<4x256xf32>
    tpu.vector_store %arg12[%c0_55, %c0_56], %43 {strides = array<i32>} : memref<4x256xf32, #tpu.memory_space<vmem>>, vector<4x256xf32>,
    %c0_57 = arith.constant 0 : index
    %c0_58 = arith.constant 0 : index
    %168 = vector.load %arg13[%c0_57, %c0_58] : memref<4x256xf32, #tpu.memory_space<vmem>>, vector<4x256xf32>
    tpu.vector_store %arg13[%c0_57, %c0_58], %44 {strides = array<i32>} : memref<4x256xf32, #tpu.memory_space<vmem>>, vector<4x256xf32>,
    %c0_59 = arith.constant 0 : index
    %c0_60 = arith.constant 0 : index
    %169 = vector.load %arg14[%c0_59, %c0_60] : memref<4x256xf32, #tpu.memory_space<vmem>>, vector<4x256xf32>
    tpu.vector_store %arg14[%c0_59, %c0_60], %41 {strides = array<i32>} : memref<4x256xf32, #tpu.memory_space<vmem>>, vector<4x256xf32>,
    %c0_61 = arith.constant 0 : index
    %c0_62 = arith.constant 0 : index
    %170 = vector.load %arg15[%c0_61, %c0_62] : memref<4x256xf32, #tpu.memory_space<vmem>>, vector<4x256xf32>
    tpu.vector_store %arg15[%c0_61, %c0_62], %42 {strides = array<i32>} : memref<4x256xf32, #tpu.memory_space<vmem>>, vector<4x256xf32>,
    %c0_63 = arith.constant 0 : index
    %c0_64 = arith.constant 0 : index
    %171 = vector.load %arg16[%c0_63, %c0_64] : memref<1x256xf32, #tpu.memory_space<vmem>>, vector<1x256xf32>
    tpu.vector_store %arg16[%c0_63, %c0_64], %94 {strides = array<i32>} : memref<1x256xf32, #tpu.memory_space<vmem>>, vector<1x256xf32>,
    return
  }
  func.func @transform_0(%arg0: i32) -> (i32, i32) {
    %c0_i32 = arith.constant 0 : i32
    %c0_i32_0 = arith.constant 0 : i32
    return %c0_i32, %arg0 : i32, i32
  }
  func.func @transform_1(%arg0: i32) -> (i32, i32) {
    %c0_i32 = arith.constant 0 : i32
    %c0_i32_0 = arith.constant 0 : i32
    return %c0_i32, %arg0 : i32, i32
  }
  func.func @transform_2(%arg0: i32) -> (i32, i32) {
    %c0_i32 = arith.constant 0 : i32
    %c0_i32_0 = arith.constant 0 : i32
    %c0_i32_1 = arith.constant 0 : i32
    return %c0_i32, %c0_i32_0 : i32, i32
  }
  func.func @transform_3(%arg0: i32) -> (i32, i32) {
    %c0_i32 = arith.constant 0 : i32
    %c0_i32_0 = arith.constant 0 : i32
    %c0_i32_1 = arith.constant 0 : i32
    return %c0_i32, %c0_i32_0 : i32, i32
  }
  func.func @transform_4(%arg0: i32) -> (i32, i32) {
    %c0_i32 = arith.constant 0 : i32
    %c0_i32_0 = arith.constant 0 : i32
    %c0_i32_1 = arith.constant 0 : i32
    return %c0_i32, %c0_i32_0 : i32, i32
  }
  func.func @transform_5(%arg0: i32) -> (i32, i32) {
    %c0_i32 = arith.constant 0 : i32
    %c0_i32_0 = arith.constant 0 : i32
    %c0_i32_1 = arith.constant 0 : i32
    return %c0_i32, %c0_i32_0 : i32, i32
  }
  func.func @transform_6(%arg0: i32) -> (i32, i32) {
    %c0_i32 = arith.constant 0 : i32
    %c0_i32_0 = arith.constant 0 : i32
    %c0_i32_1 = arith.constant 0 : i32
    return %c0_i32, %c0_i32_0 : i32, i32
  }
  func.func @transform_7(%arg0: i32) -> (i32, i32) {
    %c0_i32 = arith.constant 0 : i32
    %c0_i32_0 = arith.constant 0 : i32
    %c0_i32_1 = arith.constant 0 : i32
    return %c0_i32, %c0_i32_0 : i32, i32
  }
  func.func @transform_8(%arg0: i32) -> (i32, i32) {
    %c0_i32 = arith.constant 0 : i32
    %c0_i32_0 = arith.constant 0 : i32
    return %c0_i32, %arg0 : i32, i32
  }
  func.func @transform_9(%arg0: i32) -> (i32, i32) {
    %c0_i32 = arith.constant 0 : i32
    %c0_i32_0 = arith.constant 0 : i32
    return %c0_i32, %arg0 : i32, i32
  }
  func.func @transform_10(%arg0: i32) -> (i32, i32) {
    %c0_i32 = arith.constant 0 : i32
    %c0_i32_0 = arith.constant 0 : i32
    return %c0_i32, %arg0 : i32, i32
  }
  func.func @transform_11(%arg0: i32) -> (i32, i32) {
    %c0_i32 = arith.constant 0 : i32
    %c0_i32_0 = arith.constant 0 : i32
    return %c0_i32, %arg0 : i32, i32
  }
  func.func @transform_12(%arg0: i32) -> (i32, i32) {
    %c0_i32 = arith.constant 0 : i32
    %c0_i32_0 = arith.constant 0 : i32
    return %c0_i32, %arg0 : i32, i32
  }
  func.func @transform_13(%arg0: i32) -> (i32, i32) {
    %c0_i32 = arith.constant 0 : i32
    %c0_i32_0 = arith.constant 0 : i32
    return %c0_i32, %arg0 : i32, i32
  }
  func.func @transform_14(%arg0: i32) -> (i32, i32) {
    %c0_i32 = arith.constant 0 : i32
    %c0_i32_0 = arith.constant 0 : i32
    return %c0_i32, %arg0 : i32, i32
  }
  func.func @transform_15(%arg0: i32) -> (i32, i32) {
    %c0_i32 = arith.constant 0 : i32
    %c0_i32_0 = arith.constant 0 : i32
    return %c0_i32, %arg0 : i32, i32
  }
  func.func @transform_16(%arg0: i32) -> (i32, i32, i32) {
    %c0_i32 = arith.constant 0 : i32
    %c0_i32_0 = arith.constant 0 : i32
    %c0_i32_1 = arith.constant 0 : i32
    return %arg0, %c0_i32, %c0_i32_0 : i32, i32, i32
  }
}

</mosaic_0001>

<bundles_post_ra>
// kernel: tpu_custom_call.1
= control target key start
LH: loop header
LB: loop body
LE: loop exit
PB: predicated region body
PF: predicated region fallthrough
CT: control target
= control target key end

     0   :  { %s3318_s0 = inlined_call_operand.hbm [shape: f32[8,512], index: 0, kind: input, shape index: {}]   ;;  %s3319_s1 = inlined_call_operand.vmem [shape: f32[4,512], index: 1, kind: input, shape index: {}]   ;;  %s3320_s2 = inlined_call_operand.hbm [shape: f32[9,256], index: 2, kind: input, shape index: {}]   ;;  %s3321_s3 = inlined_call_operand.vmem [shape: f32[1,256], index: 3, kind: input, shape index: {}]   ;;  %s3322_s4 = inlined_call_operand.vmem [shape: bf16[16,72], index: 4, kind: input, shape index: {}]   ;;  %s3323_s5 = inlined_call_operand.vmem [shape: f32[16,1], index: 5, kind: input, shape index: {}]   ;;  %s3324_s6 = inlined_call_operand.vmem [shape: bf16[4,36], index: 6, kind: input, shape index: {}]   ;;  %s3325_s7 = inlined_call_operand.vmem [shape: f32[4,1], index: 7, kind: input, shape index: {}]   ;;  %s3326_s8 = inlined_call_operand.hbm [shape: f32[4,512], index: 8, kind: output, shape index: {0}]   ;;  %s3327_s9 = inlined_call_operand.hbm [shape: f32[4,512], index: 9, kind: output, shape index: {1}]   ;;  %s3328_s10 = inlined_call_operand.hbm [shape: f32[4,512], index: 10, kind: output, shape index: {2}]   ;;  %s3329_s11 = inlined_call_operand.hbm [shape: f32[4,512], index: 11, kind: output, shape index: {3}]   ;;  %s3330_s12 = inlined_call_operand.hbm [shape: f32[4,512], index: 12, kind: output, shape index: {4}]   ;;  %s3331_s13 = inlined_call_operand.hbm [shape: f32[4,512], index: 13, kind: output, shape index: {5}]   ;;  %s3332_s14 = inlined_call_operand.hbm [shape: f32[4,512], index: 14, kind: output, shape index: {6}]   ;;  %s3333_s15 = inlined_call_operand.hbm [shape: f32[1,512], index: 15, kind: output, shape index: {7}]   ;;  %s3334_s16 = inlined_call_operand.hbm [shape: f32[2,1,8], index: 16, kind: output, shape index: {8}]  }
   0x1   :  { %3360 = sst [smem:[#allocation30_spill]] %s3318_s0 }
   0x2   :  { %3361 = sst [smem:[#allocation31_spill]] %s3319_s1 }
   0x3   :  { %3362 = sst [smem:[#allocation32_spill]] %s3320_s2 }
   0x4   :  { %3363 = sst [smem:[#allocation33_spill]] %s3321_s3 }
   0x5   :  { %3364 = sst [smem:[#allocation34_spill]] %s3322_s4 }
   0x6   :  { %3365 = sst [smem:[#allocation35_spill]] %s3323_s5 }
   0x7   :  { %3366 = sst [smem:[#allocation36_spill]] %s3324_s6 }
   0x8   :  { %3367 = sst [smem:[#allocation37_spill]] %s3326_s8 }
   0x9   :  { %3368 = sst [smem:[#allocation38_spill]] %s3328_s10 }
   0xa   :  { %3369 = sst [smem:[#allocation39_spill]] %s3330_s12 }
   0xb   :  { %3370 = sst [smem:[#allocation40_spill]] %s3332_s14 }
   0xc   :  { %3371 = sst [smem:[#allocation41_spill]] %s3333_s15 }
   0xd   :  { %3372 = sst [smem:[#allocation42_spill]] %s3334_s16 }
   0xe   :  { %22 = vsyncpa [#allocation3], 0 }
   0xf   :  { %24 = vsyncpa [#allocation3 + $0x1], 0 }
  0x10   :  { %25 = vsyncpa [#allocation6], 0 }
  0x11   :  { %26 = vsyncpa [#allocation4], 0 }
  0x12   :  { %28 = vsyncpa [#allocation4 + $0x1], 0 }
  0x13   :  { %29 = vsyncpa [#allocation9], 0 }
  0x14   :  { %31 = vsyncpa [#allocation9 + $0x1], 0 }
  0x15   :  { %32 = vsyncpa [#allocation12], 0 }
  0x16   :  { %34 = vsyncpa [#allocation12 + $0x1], 0 }
  0x17   :  { %35 = vsyncpa [#allocation15], 0 }
  0x18   :  { %37 = vsyncpa [#allocation15 + $0x1], 0 }
  0x19   :  { %38 = vsyncpa [#allocation18], 0 }
  0x1a   :  { %40 = vsyncpa [#allocation18 + $0x1], 0  ;;  %s2475_s21 = smov 0   ;;  %s2477_s22 = smov 0  }
  0x1b   :  { %s2479_s23 = smov 0   ;;  %s2481_s24 = smov 0  }
  0x1c LB: > { %3373 = sst [smem:[#allocation27_spill]] %s2352_s21  ;;  %s2496_s25 = sadd.s32 4294967295, %s2364_s24   ;;  %s2364_s24 = sphi %s2481_s24, %s3417_s24   ;;  %s2360_s23 = sphi %s2479_s23, %s3420_s23   ;;  %s2356_s22 = sphi %s2477_s22, %s3419_s22   ;;  %s2352_s21 = sphi %s2475_s21, %s3418_s21  }
  0x1d   : > { %s3336_s26 = sadd.s32 4294967294, %s2364_s24   ;;  %p66_p0 = scmp.ne.s32.totalorder %s2356_s22, %s2352_s21 }
  0x1e   : > { %p3344_p1 = scmp.eq.s32.totalorder %s2496_s25, 0  ;;  %p248_p3 = scmp.eq.s32.totalorder %s3336_s26, 1 }
  0x1f   : > { %p1793_p5 = scmp.ge.s32.totalorder %s2364_s24, 1  ;;  %p463_p7 = scmp.lt.s32.totalorder %s2364_s24, 3 }
  0x20   : > { %p2507_p4 = por %p3344_p1, %p66_p0  ;;  %p2512_p6 = por %p248_p3, %p66_p0 }
  0x21   : > { %p2517_p8 = pnand %p1793_p5, %p463_p7  ;;  %s2366_s30 = smov [#allocation5]  }
  0x22   : > { %s3374_s27 = scalar_select %p2507_p4, 1, 0 }
  0x23   : > { %s3375_s28 = scalar_select %p2512_p6, 1, 0 }
  0x24   : > { %s3377_s29 = scalar_select %p2517_p8, 1, 0 }
  0x25   : > { %3376 = sst [smem:[#allocation28_spill]] %s3375_s28  ;;  %s475_s0 = sshll.u32 %s2366_s30, 4  ;;  %s2521_s0 = int_to_ptr.vmem [resolvable:$true] %s475_s0 }
  0x26   : > { %p1890_p9 = pneg %p2517_p8  ;;  %s2533_s18 = sadd.s32 1, %s2364_s24  }
  0x27   : > { %3379 = sst [smem:[#allocation29_spill]] %s2533_s18  ;;  %s53_s19 = sadd.s32 1, %s2360_s23 }
  0x28   : > { %p2528_p11 = pnand %p1890_p9, %p3344_p1  ;;  %s50_s20 = ssub.s32 %s2364_s24, %s2533_s18 }
  0x29   : > { %s3380_s2 = sld [smem:[#allocation32_spill]] }
  0x2a   : > { %p1998_p13 = pneg %p2528_p11 }
  0x2f   : > { %s1996_s30 = scalar_lea.hbm %s3380_s2, 512 }
  0x30   : > { %p1997_p12 = scmp.ne.s32.totalorder %s3380_s2, %s1996_s30  ;;  %p2003_p5 = scmp.lt.u32.totalorder %s1996_s30, %s3380_s2 }
  0x32   : > { %p1999_p0 = pnand %p1998_p13, %p1997_p12 }
  0x34   : > { %p2000_p3 = pneg %p1999_p0 }
  0x36   : > { %p2005_p7 = pnand %p2003_p5, %p2000_p3 }
  0x38   : > { %2008 = shalt.err (!%p2005_p7)
}
  0x39   : > { %s2009_s18 = scalar_lea.vmem %s2521_s0, 512  ;;  %p2017_p2 = scmp.lt.s32.totalorder %s2521_s0, %s2521_s0 }
  0x3a   : > { %p2010_p9 = scmp.ne.s32.totalorder %s2521_s0, %s2009_s18  ;;  %p2018_p6 = scmp.lt.s32.totalorder %s2009_s18, %s2009_s18 }
  0x3c   : > { %p2012_p10 = pnand %p2010_p9, %p1998_p13  ;;  %p2019_p4 = por %p2018_p6, %p2017_p2 }
  0x3e   : > { %p2013_p1 = pneg %p2012_p10 }
  0x40   : > { %p2020_p8 = pnand %p2019_p4, %p2013_p1 }
  0x42   : > { %2023 = shalt.err (!%p2020_p8)
}
  0x43   : > { %s2367_s16 = smov 256   ;;  %s2368_s8 = smov 16  }
  0x44   : > { %1893 = dma.hbm_to_vmem [thread:$0]  (!%p2528_p11), %s3380_s2, 512, %s2521_s0, [#allocation6], %s2367_s16, %s2367_s16, %s2368_s8  }
  0x45   : > { %p51_p2 = scmp.eq.s32.totalorder %s50_s20, 0  ;;  %p60_p1 = scmp.ne.s32.totalorder %s2360_s23, %s2356_s22 }
  0x46   : > { %p61_p4 = scmp.eq.s32.totalorder %s2364_s24, 0  ;;  %p1927_p6 = scmp.lt.s32.totalorder %s2364_s24, 2 }
  0x47   : > { %s2564_s26 = scalar_select %p51_p2, %s2360_s23, %s53_s19  }
  0x48   : > { %p62_p8 = por %p61_p4, %p60_p1  ;;  %p3381_p10 = scmp.eq.s32.totalorder %s2496_s25, 1 }
  0x49   : > { %s504_s18 = sand.u32 1, %s2360_s23   ;;  %s1849_s30 = sshll.u32 %s2364_s24, 8 }
  0x4a   : > { %p2568_p12 = por %p3381_p10, %p60_p1  ;;  %s1796_s12 = sshll.u32 %s504_s18, 4 }
  0x4b   : > { %s3383_s15 = sld [smem:[#allocation30_spill]]  ;;  %s508_s0 = scalar_lea.vmem [#allocation2], %s1796_s12 }
  0x4c   : > { %s516_s19 = sshll.u32 %s508_s0, 4  ;;  %p2579_p11 = pnand %p1927_p6, %p62_p8  ;;  %s2583_s19 = int_to_ptr.vmem [resolvable:$true] %s516_s19 }
  0x4d   : > { %s505_s16 = scalar_lea.sflag [#allocation3], %s504_s18 }
  0x4e   : > { %p2026_p0 = pneg %p2579_p11 }
  0x51   : > { %s2577_s14 = scalar_lea.hbm %s3383_s15, %s1849_s30  ;;  %s2029_s21 = scalar_lea.hbm %s3383_s15, 512 }
  0x52   : > { %s2024_s8 = scalar_lea.hbm %s2577_s14, 256  ;;  %p2030_p7 = scmp.lt.u32.totalorder %s2577_s14, %s3383_s15 }
  0x53   : > { %p2025_p13 = scmp.ne.s32.totalorder %s2577_s14, %s2024_s8  ;;  %p2031_p9 = scmp.lt.u32.totalorder %s2029_s21, %s2024_s8 }
  0x54   : > { %p2033_p1 = scmp.lt.u32.totalorder %s2024_s8, %s2577_s14 }
  0x55   : > { %p2027_p3 = pnand %p2026_p0, %p2025_p13  ;;  %p2032_p2 = por %p2031_p9, %p2030_p7 }
  0x57   : > { %p2028_p5 = pneg %p2027_p3  ;;  %p2034_p4 = por %p2033_p1, %p2032_p2 }
  0x59   : > { %p2035_p6 = pnand %p2034_p4, %p2028_p5 }
  0x5b   : > { %2038 = shalt.err (!%p2035_p6)
}
  0x5c   : > { %s2039_s18 = scalar_lea.vmem %s2583_s19, 256  ;;  %s2369_s0 = smov [#allocation2]  }
  0x5d   : > { %p2040_p8 = scmp.ne.s32.totalorder %s2583_s19, %s2039_s18  ;;  %s2044_s10 = sshll.u32 %s2369_s0, 4  ;;  %s2045_s10 = int_to_ptr.vmem [resolvable:$false] %s2044_s10 }
  0x5e   : > { %s2046_s12 = scalar_lea.vmem %s2045_s10, 512  ;;  %p2047_p3 = scmp.lt.s32.totalorder %s2583_s19, %s2045_s10 }
  0x5f   : > { %p2042_p10 = pnand %p2040_p8, %p2026_p0  ;;  %p2048_p7 = scmp.lt.s32.totalorder %s2046_s12, %s2039_s18 }
  0x61   : > { %p2043_p13 = pneg %p2042_p10  ;;  %p2049_p9 = por %p2048_p7, %p2047_p3 }
  0x63   : > { %p2050_p2 = pnand %p2049_p9, %p2043_p13 }
  0x65   : > { %2053 = shalt.err (!%p2050_p2)
}
  0x66   : > { %1897 = dma.hbm_to_vmem [thread:$0]  (!%p2579_p11), %s2577_s14, 256, %s2583_s19, %s505_s16  }
  0x67   : > { %p3385_p5 = scmp.ne.s32.totalorder %s3377_s29, 0 }
  0x68   : > { %s2613_s8 = sand.u32 (!%p3385_p5), 1, %s2356_s22   ;;  %p3386_p0 = scmp.ne.s32.totalorder (!%p3385_p5), %s3374_s27, 0 }
  0x69   : > { %534 = sbr.rel (%p3385_p5) target bundleno = 983 (0x3d7), region = 52  ;;  %s1800_s21 = sshll.u32 (!%p3385_p5), %s2613_s8, 4 }
  0x6a   : > { %s537_s30 = scalar_lea.sflag (!%p3385_p5), [#allocation3], %s2613_s8  ;;  %s540_s17 = scalar_lea.vmem (!%p3385_p5), [#allocation2], %s1800_s21 }
  0x70   : > { %2323 = dma.done.wait (%p3386_p0), %s537_s30, 256  }
  0x71   : > { %2325 = vsyncadd (%p3386_p0), %s537_s30, 4294967040  ;;  %p3387_p1 = scmp.eq.s32.totalorder %s2496_s25, 0 }
  0x73   : > { %2327 = dma.done.wait (%p3387_p1), [#allocation6], 512   ;;  %p3388_p11 = pmov %p3387_p1 }
  0x74   : > { %v2625_v0 = vld [vmem:[%s540_s17] sm:$0xff]  ;;  %s2370_s29 = smov 16   ;;  %s2371_s14 = smov 17   ;;  %v2631_v1 = vld [vmem:[%s540_s17 + $0x8] sm:$0xff]  ;;  %v2376_v2 = vmov 0   ;;  %v663_v5 = vlaneseq  ;;  %vm830_vm8 = vcmask 1043456  }
  0x75   : > { %2329 = vsyncadd (%p3388_p11), [#allocation6], 4294966784  ;;  %678 = vrot.lane.b32.xlu1 %v2625_v0, %s2370_s29  ;;  %659 = vrot.lane.b32.xlu0 %v2625_v0, %s2371_s14  ;;  %s2372_s27 = smov 15   ;;  %s2373_s19 = smov 1   ;;  %v2679_v10 = vld [vmem:[#allocation5] sm:$0xff]  ;;  %v2681_v11 = vld [vmem:[#allocation5 + $0x8] sm:$0xff] }
  0x76   : > { %s2374_s20 = smov 127   ;;  %s2375_s16 = smov 113   ;;  %869 = vmatprep.mubr.bf16.mxu0 %v2376_v2  ;;  %1977 = vset.pattern.permute.xlu1 %v2376_v2  ;;  %v2668_v6 = vshrl.u32 %v663_v5, 7  ;;  %v2671_v7 = vand.u32 127, %v663_v5  ;;  %vm826_vm9 = vcmask 588800   ;;  %vm1050_vm12 = vcmask 1047556  }
  0x77   : > { %1976 = vset.pattern.permute.xlu0 %v2376_v2  ;;  %1236 = vmatprep.mubr.bf16.mxu1 %v2376_v2  ;;  %s2377_s18 = smov 112   ;;  %s3354_s0 = smov 111   ;;  %vm1292_vm15 = vcmp.lt.s32.totalorder %v663_v5, 256 }
  0x78   : > { %s3389_s5 = sld [smem:[#allocation35_spill]]  ;;  %v2674_v8 = vsub.s32 1, %v2668_v6  ;;  %v2677_v9 = vsub.s32 0, %v2668_v6  ;;  %vm682_vm0 = vcmp.lt.s32.totalorder %v2671_v7, 16  ;;  %vm665_vm1 = vcmp.lt.s32.totalorder %v2671_v7, 17  ;;  %s3390_s4 = sld [smem:[#allocation34_spill]] }
  0x79   : > { %680 = vrot.lane.b32.xlu1 %v2631_v1, %s2370_s29  ;;  %661 = vrot.lane.b32.xlu0 %v2631_v1, %s2371_s14  ;;  %v704_v20 = vsub.s32 2, %v2668_v6  ;;  %v721_v21 = vsub.s32 3, %v2668_v6  ;;  %vm699_vm2 = vcmp.lt.s32.totalorder %v2671_v7, 15  ;;  %vm716_vm3 = vcmp.lt.s32.totalorder %v2671_v7, 1  ;;  %s2802_s12 = sshll.u32 %s2613_s8, 3  ;;  %s3391_s1 = sld [smem:[#allocation31_spill]] }
  0x7a   : > { %v2687_v14 = vrot.slane %v2679_v10, %v2674_v8  ;;  %v2691_v15 = vrot.slane %v2679_v10, %v2677_v9  ;;  %v2695_v16 = vrot.slane %v2681_v11, %v2677_v9  ;;  %v2699_v17 = vrot.slane %v2681_v11, %v2674_v8  ;;  %s3350_s21 = scalar_lea.vmem [#allocation14], %s2802_s12  ;;  %s3351_s30 = scalar_lea.vmem [#allocation16], %s2802_s12 }
  0x7b   : > { %v738_v34 = vsub.s32 5, %v2668_v6  ;;  %v2719_v35 = vrot.slane %v2679_v10, %v704_v20  ;;  %v2722_v36 = vrot.slane %v2681_v11, %v704_v20  ;;  %v2725_v37 = vrot.slane %v2679_v10, %v721_v21  ;;  %s3353_s17 = scalar_lea.vmem [#allocation11], %s2802_s12  ;;  %s3352_s10 = scalar_lea.vmem [#allocation13], %s2802_s12 }
  0x7c   : > { %v2728_v38 = vrot.slane %v2681_v11, %v721_v21  ;;  %vm733_vm4 = vcmp.lt.s32.totalorder %v2671_v7, 127  ;;  %v755_v57 = vsub.s32 6, %v2668_v6  ;;  %v772_v60 = vsub.s32 7, %v2668_v6  ;;  %s3393_s3 = sld [smem:[#allocation33_spill]]  ;;  %s3394_s6 = sld [smem:[#allocation36_spill]] }
  0x7d   : > { %697 = vrot.lane.b32.xlu1 %v2631_v1, %s2372_s27  ;;  %695 = vrot.lane.b32.xlu0 %v2625_v0, %s2372_s27  ;;  %v2740_v45 = vrot.slane %v2679_v10, %v738_v34  ;;  %v2743_v46 = vrot.slane %v2681_v11, %v738_v34  ;;  %vm750_vm5 = vcmp.lt.s32.totalorder %v2671_v7, 113  ;;  %vm767_vm6 = vcmp.lt.s32.totalorder %v2671_v7, 112 }
  0x7e   : > { %v809_v3 = vld [vmem:[%s3389_s5] sm:$0xff]  ;;  %v810_v4 = vld [vmem:[%s3389_s5 + $0x8] sm:$0xff]  ;;  %vm784_vm7 = vcmp.lt.s32.totalorder %v2671_v7, 111 }
  0x81   : > { %714 = vrot.lane.b32.xlu1 %v2631_v1, %s2373_s19  ;;  %712 = vrot.lane.b32.xlu0 %v2625_v0, %s2373_s19 }
  0x85   : > { %731 = vrot.lane.b32.xlu1 %v2631_v1, %s2374_s20  ;;  %729 = vrot.lane.b32.xlu0 %v2625_v0, %s2374_s20 }
  0x89   : > { %748 = vrot.lane.b32.xlu1 %v2631_v1, %s2375_s16  ;;  %746 = vrot.lane.b32.xlu0 %v2625_v0, %s2375_s16 }
  0x8d   : > { %765 = vrot.lane.b32.xlu1 %v2631_v1, %s2377_s18  ;;  %763 = vrot.lane.b32.xlu0 %v2625_v0, %s2377_s18 }
  0x91   : > { %782 = vrot.lane.b32.xlu1 %v2631_v1, %s3354_s0  ;;  %780 = vrot.lane.b32.xlu0 %v2625_v0, %s3354_s0 }
  0x95   : > { %813 = vperm.xlu1 %1977, %v809_v3   ;;  %818 = vperm.xlu0 %1976, %v810_v4   ;;  %v2761_v3 = vrot.slane %v2679_v10, %v755_v57  ;;  %v2764_v4 = vrot.slane %v2681_v11, %v755_v57 }
  0xe7   : > { %v679_v12 = vpop.permute.xlu1 %678  ;;  %v660_v13 = vpop.permute.xlu0 %659 }
  0xeb   : > { %v681_v18 = vpop.permute.xlu1 %680  ;;  %v662_v19 = vpop.permute.xlu0 %661 }
  0xec   : > { %v683_v22 = vsel %vm682_vm0, %v679_v12, %v681_v18  ;;  %v684_v23 = vsel %vm682_vm0, %v681_v18, %v679_v12  ;;  %v666_v24 = vsel %vm665_vm1, %v660_v13, %v662_v19  ;;  %v667_v25 = vsel %vm665_vm1, %v662_v19, %v660_v13 }
  0xed   : > { %v693_v26 = vmul.f32 %v2687_v14, %v684_v23  ;;  %v676_v27 = vmul.f32 %v2691_v15, %v667_v25  ;;  %v677_v28 = vmul.f32 %v2695_v16, %v666_v24  ;;  %v694_v29 = vmul.f32 %v2699_v17, %v683_v22  ;;  %v2786_v24 = vld [vmem:[#allocation5 + $0x10] ss:$0 sm:$0xff]  ;;  %v2788_v25 = vld [vmem:[#allocation5 + $0x18] ss:$0 sm:$0xff] }
  0xee   : > { %v2768_v12 = vrot.slane %v2679_v10, %v772_v60  ;;  %v2771_v13 = vrot.slane %v2681_v11, %v772_v60 }
  0xef   : > { %v698_v30 = vpop.permute.xlu1 %697  ;;  %v696_v31 = vpop.permute.xlu0 %695  ;;  %v798_v32 = vpack.c.bf16 %v694_v29, %v677_v28  ;;  %v797_v33 = vpack.c.bf16 %v693_v26, %v676_v27 }
  0xf0   : > { %v700_v39 = vsel %vm699_vm2, %v696_v31, %v698_v30  ;;  %v701_v40 = vsel %vm699_vm2, %v698_v30, %v696_v31 }
  0xf1   : > { %837 = vmatprep.subr.bf16.mxu0 %v798_v32  ;;  %v710_v47 = vmul.f32 %v2719_v35, %v701_v40  ;;  %v711_v48 = vmul.f32 %v2722_v36, %v700_v39 }
  0xf2   : > { %838 = vmatpush1.bf16.msra.mxu0 %v797_v33 }
  0xf3   : > { %v715_v41 = vpop.permute.xlu1 %714  ;;  %v713_v42 = vpop.permute.xlu0 %712 }
  0xf4   : > { %v717_v43 = vsel %vm716_vm3, %v713_v42, %v715_v41  ;;  %v718_v44 = vsel %vm716_vm3, %v715_v41, %v713_v42  ;;  %v1978_v41 = vld [vmem:[%s3390_s4] sm:$0xff]  }
  0xf5   : > { %v727_v49 = vmul.f32 %v2725_v37, %v718_v44  ;;  %v728_v50 = vmul.f32 %v2728_v38, %v717_v43 }
  0xf7   : > { %v732_v51 = vpop.permute.xlu1 %731  ;;  %v730_v52 = vpop.permute.xlu0 %729  ;;  %v800_v53 = vpack.c.bf16 %v728_v50, %v711_v48  ;;  %v799_v54 = vpack.c.bf16 %v727_v49, %v710_v47 }
  0xf8   : > { %v734_v55 = vsel %vm733_vm4, %v730_v52, %v732_v51  ;;  %v735_v56 = vsel %vm733_vm4, %v732_v51, %v730_v52 }
  0xf9   : > { %v744_v58 = vmul.f32 %v2740_v45, %v734_v55  ;;  %v745_v59 = vmul.f32 %v2743_v46, %v735_v56  ;;  %839 = vmatprep.subr.bf16.mxu0 %v800_v53 }
  0xfa   : > { %840 = vmatpush1.bf16.msra.mxu0 %v799_v54 }
  0xfb   : > { %v749_v61 = vpop.permute.xlu1 %748  ;;  %v747_v62 = vpop.permute.xlu0 %746  ;;  %v802_v63 = vpack.c.bf16 %v745_v59, %v2631_v1  ;;  %v801_v2 = vpack.c.bf16 %v744_v58, %v2625_v0 }
  0xfc   : > { %v751_v1 = vsel %vm750_vm5, %v747_v62, %v749_v61  ;;  %v752_v0 = vsel %vm750_vm5, %v749_v61, %v747_v62 }
  0xfd   : > { %841 = vmatprep.subr.bf16.mxu0 %v802_v63  ;;  %v761_v10 = vmul.f32 %v2761_v3, %v751_v1  ;;  %v762_v11 = vmul.f32 %v2764_v4, %v752_v0 }
  0xfe   : > { %842 = vmatpush1.bf16.msra.mxu0 %v801_v2 }
  0xff   : > { %v766_v18 = vpop.permute.xlu1 %765  ;;  %v764_v19 = vpop.permute.xlu0 %763 }
 0x100   : > { %v768_v20 = vsel %vm767_vm6, %v764_v19, %v766_v18  ;;  %v769_v21 = vsel %vm767_vm6, %v766_v18, %v764_v19 }
 0x101   : > { %v778_v22 = vmul.f32 %v2768_v12, %v768_v20  ;;  %v779_v23 = vmul.f32 %v2771_v13, %v769_v21 }
 0x103   : > { %v783_v26 = vpop.permute.xlu1 %782  ;;  %v781_v27 = vpop.permute.xlu0 %780  ;;  %v804_v28 = vpack.c.bf16 %v779_v23, %v762_v11  ;;  %v803_v29 = vpack.c.bf16 %v778_v22, %v761_v10 }
 0x104   : > { %v785_v30 = vsel %vm784_vm7, %v781_v27, %v783_v26  ;;  %v786_v31 = vsel %vm784_vm7, %v783_v26, %v781_v27 }
 0x105   : > { %v795_v32 = vmul.f32 %v2786_v24, %v785_v30  ;;  %v796_v33 = vmul.f32 %v2788_v25, %v786_v31  ;;  %843 = vmatprep.subr.bf16.mxu0 %v804_v28 }
 0x106   : > { %844 = vmatpush1.bf16.msra.mxu0 %v803_v29 }
 0x107   : > { %v805_v34 = vpack.c.bf16 %v795_v32, %v795_v32  ;;  %v806_v39 = vpack.c.bf16 %v796_v33, %v796_v33 }
 0x109   : > { %1815 = vmatprep.subr.msk.bf16.mxu0 %vm830_vm8, %v806_v39  ;;  %v832_v40 = vsel %vm830_vm8, %v805_v34, 0 }
 0x10a   : > { %846 = vmatpush1.bf16.msra.mxu0 %v832_v40 }
 0x10d   : > { %1816 = vmatmul.mubr.msk.bf16.vlgmr.msra.gmra.mrb[0].mxu0 %vm826_vm9, %v1978_v41  ;;  %vm994_vm9 = vcmask 1040384  }
 0x114   : > { %v814_v42 = vpop.permute.xlu1 %813  ;;  %v819_v44 = vpop.permute.xlu0 %818 }
 0x1e0   : > { %v871_v43 = vpop.f32.mrb[0].mxu0 }
 0x1e1   : > { %v2804_v47 = vadd.f32 %v871_v43, %v814_v42  ;;  %v873_v48 = vpop.f32.mrb[1].mxu0 }
 0x1e2   : > { %v2806_v49 = vadd.f32 %v873_v48, %v814_v42  ;;  %v875_v50 = vpop.f32.mrb[2].mxu0 }
 0x1e3   : > { %v896_v51 = vmax.f32 %v2804_v47, 0.0  ;;  %v2809_v52 = vadd.f32 %v875_v50, %v819_v44  ;;  %v877_v53 = vpop.f32.mrb[3].mxu0  ;;  %vm894_vm10 = vcmp.gt.f32.partialorder %v2804_v47, 0.0 }
 0x1e4   : > { %v897_v54 = vmax.f32 %v2806_v49, 0.0  ;;  %v2812_v55 = vadd.f32 %v877_v53, %v819_v44  ;;  %v1266_v56 = vcombine.low %v2804_v47, %v2806_v49  ;;  %v1269_v59 = vcombine.high %v2804_v47, %v2806_v49 }
 0x1e5   : > { %v898_v57 = vadd.f32 1.0, %v896_v51  ;;  %v882_v58 = vmax.f32 %v2809_v52, 0.0  ;;  %vm880_vm11 = vcmp.gt.f32.partialorder %v2809_v52, 0.0  ;;  %vm895_vm13 = vcmp.gt.f32.partialorder %v2806_v49, 0.0 }
 0x1e6   : > { %v899_v60 = vadd.f32 1.0, %v897_v54  ;;  %v883_v61 = vmax.f32 %v2812_v55, 0.0  ;;  %v1258_v62 = vcombine.low %v2809_v52, %v2812_v55  ;;  %1268 = vst [vmem:[%s3350_s21] sm:$0xff] %v1266_v56  ;;  %v1261_v2 = vcombine.high %v2809_v52, %v2812_v55  ;;  %1271 = vst [vmem:[%s3351_s30] sm:$0xff] %v1269_v59  ;;  %s1810_s21 = sshll.u32 %s2496_s25, 1 }
 0x1e7   : > { %1980 = vlog2.f32 %v898_v57  ;;  %v884_v63 = vadd.f32 1.0, %v882_v58  ;;  %p639_p4 = scmp.lt.s32.totalorder %s1810_s21, 3  ;;  %vm881_vm14 = vcmp.gt.f32.partialorder %v2812_v55, 0.0 }
 0x1e8   : > { %1982 = vlog2.f32 %v899_v60  ;;  %v885_v1 = vadd.f32 1.0, %v883_v61  ;;  %1260 = vst [vmem:[%s3353_s17] sm:$0xff] %v1258_v62  ;;  %1263 = vst [vmem:[%s3352_s10] sm:$0xff] %v1261_v2  ;;  %s2987_s10 = sand.u32 1, %s2496_s25  }
 0x1e9   : > { %1984 = vlog2.f32 %v884_v63  ;;  %s3422_s21 = smov (!%p639_p4, %s1810_s21), 3 }
 0x1ea   : > { %1986 = vlog2.f32 %v885_v1  ;;  %s1811_s30 = sshll.u32 %s3422_s21, 2 }
 0x1eb   : > { %s642_s0 = scalar_lea.vmem %s3391_s1, %s1811_s30 }
 0x1ec   : > { %v920_v54 = vld [vmem:[%s642_s0] sm:$0xff]  ;;  %s588_s0 = scalar_lea.vmem [#allocation8], %s2802_s12 }
 0x1ed   : > { %v922_v56 = vcombine.low %v920_v54, %v920_v54 }
 0x1f1   : > { %v1981_v0 = vpop.eup %1980 }
 0x1f2   : > { %v1983_v18 = vpop.eup %1982  ;;  %v901_v19 = vmul.f32 0.6931472, %v1981_v0 }
 0x1f3   : > { %v1985_v20 = vpop.eup %1984  ;;  %v903_v21 = vmul.f32 0.6931472, %v1983_v18  ;;  %v934_v18 = vmul.f32 %v920_v54, %v920_v54 }
 0x1f4   : > { %v1987_v10 = vpop.eup %1986  ;;  %v887_v11 = vmul.f32 0.6931472, %v1985_v20  ;;  %v904_v23 = vsel %vm894_vm10, %v901_v19, %v2804_v47 }
 0x1f5   : > { %v889_v22 = vmul.f32 0.6931472, %v1987_v10  ;;  %v905_v27 = vsel %vm895_vm13, %v903_v21, %v2806_v49  ;;  %v906_v31 = vmax.f32 %v904_v23, -13.815511 }
 0x1f6   : > { %v890_v26 = vsel %vm880_vm11, %v887_v11, %v2809_v52  ;;  %v907_v34 = vmax.f32 %v905_v27, -13.815511 }
 0x1f7   : > { %v892_v28 = vmax.f32 %v890_v26, -13.815511  ;;  %v891_v29 = vsel %vm881_vm14, %v889_v22, %v2812_v55  ;;  %v914_v48 = vsub.f32 0.0, %v906_v31 }
 0x1f8   : > { %v893_v30 = vmax.f32 %v891_v29, -13.815511  ;;  %v915_v50 = vsub.f32 0.0, %v907_v34  ;;  %v957_v10 = vmul.f32 0.5, %v907_v34 }
 0x1f9   : > { %v908_v32 = vmul.f32 0.5, %v892_v28  ;;  %v2845_v33 = vsel %vm1050_vm12, %v892_v28, -inf  ;;  %v916_v51 = vmul.f32 1.442695, %v914_v48 }
 0x1fa   : > { %v909_v39 = vmul.f32 0.5, %v893_v30  ;;  %v2847_v40 = vsel %vm1050_vm12, %v893_v30, -inf  ;;  %v918_v53 = vmul.f32 1.442695, %v915_v50  ;;  %v961_v29 = vrot.slane %v957_v10, 4 }
 0x1fb   : > { %v910_v41 = vmul.f32 1.442695, %v908_v32  ;;  %v1053_v42 = vmax.f32 %v2845_v33, %v2847_v40 }
 0x1fc   : > { %v912_v43 = vmul.f32 1.442695, %v909_v39  ;;  %v938_v44 = vcombine.high %v908_v32, %v909_v39 }
 0x1fd   : > { %1988 = vpow2.f32 %v910_v41 }
 0x1fe   : > { %1990 = vpow2.f32 %v912_v43 }
 0x1ff   : > { %1992 = vpow2.f32 %v916_v51 }
 0x200   : > { %1994 = vpow2.f32 %v918_v53 }
 0x207   : > { %v1989_v57 = vpop.eup %1988 }
 0x208   : > { %v1991_v58 = vpop.eup %1990  ;;  %v924_v59 = vmul.f32 %v1989_v57, %v922_v56 }
 0x209   : > { %v925_v60 = vmul.f32 %v1991_v58, %v920_v54  ;;  %v1993_v0 = vpop.eup %1992 }
 0x20a   : > { %v928_v61 = vrot.slane %v924_v59, 4  ;;  %v1995_v20 = vpop.eup %1994 }
 0x20b   : > { %v929_v62 = vrot.slane %v925_v60, 4  ;;  %v951_v23 = vrot.slane %v1995_v20, 4  ;;  %v2379_v60 = vmov 1966171168  }
 0x20c   : > { %v2855_v63 = vadd.f32 %v928_v61, %v2809_v52  ;;  %v1276_v61 = vunpack.c.l.s4 %v2379_v60 }
 0x20d   : > { %v2858_v2 = vadd.f32 %v929_v62, %v2812_v55  ;;  %v956_v55 = vmul.f32 0.5, %v906_v31 }
 0x20e   : > { %1092 = vrot.lane.b32.xlu1 %v2855_v63, %s2370_s29  ;;  %v942_v1 = vsub.f32 %v2855_v63, %v2804_v47  ;;  %v950_v47 = vrot.slane %v1993_v0, 4 }
 0x20f   : > { %1094 = vrot.lane.b32.xlu0 %v2858_v2, %s2370_s29  ;;  %v943_v19 = vsub.f32 %v2858_v2, %v2806_v49  ;;  %v1252_v52 = vcombine.low %v2855_v63, %v2858_v2  ;;  %v935_v49 = vmul.f32 -0.5, %v934_v18  ;;  %v960_v27 = vrot.slane %v956_v55, 4  ;;  %s3356_s29 = scalar_lea.vmem [#allocation10], %s2802_s12 }
 0x210   : > { %v944_v21 = vmul.f32 %v942_v1, %v942_v1 }
 0x211   : > { %v945_v11 = vmul.f32 %v943_v19, %v943_v19  ;;  %1254 = vst [vmem:[%s588_s0] sm:$0xff] %v1252_v52  ;;  %v940_v32 = vsub.f32 %v935_v49, %v938_v44  ;;  %v1277_v19 = vunpack.c.0.s8 %v1276_v61 }
 0x212   : > { %1108 = vrot.lane.b32.xlu1 %v2855_v63, %s2373_s19  ;;  %v946_v22 = vmul.f32 -0.5, %v944_v21 }
 0x213   : > { %1110 = vrot.lane.b32.xlu0 %v2858_v2, %s2373_s19  ;;  %v947_v26 = vmul.f32 -0.5, %v945_v11  ;;  %v1817_v43 = vadd.f32 -0.9189385, %v940_v32  ;;  %v1280_v21 = vsub.s32 %v1277_v19, %v2668_v6 }
 0x214   : > { %v954_v28 = vmul.f32 %v950_v47, %v946_v22  ;;  %v990_v22 = vld [vmem:[%s3393_s3] sm:$0x3] }
 0x215   : > { %v955_v30 = vmul.f32 %v951_v23, %v947_v26  ;;  %v1016_v23 = vrot.slane %v990_v22, %v2674_v8  ;;  %v1012_v49 = vrot.slane %v990_v22, %v2677_v9  ;;  %v1187_v9 = vld [vmem:[%s3325_s7] sm:$0xf] }
 0x216   : > { %1084 = vrot.lane.b32.xlu1 %v2855_v63, %s2371_s14  ;;  %v964_v31 = vsub.f32 %v954_v28, %v960_v27 }
 0x217   : > { %1086 = vrot.lane.b32.xlu0 %v2858_v2, %s2371_s14  ;;  %v965_v34 = vsub.f32 %v955_v30, %v961_v29  ;;  %s3392_s14 = smov 111   ;;  %v1035_v29 = vcombine.high %v1817_v43, %v1817_v43 }
 0x218   : > { %v1818_v39 = vadd.f32 -0.9189385, %v964_v31 }
 0x219   : > { %v1819_v41 = vadd.f32 -0.9189385, %v965_v34  ;;  %v1038_v31 = vsel %vm830_vm8, %v1035_v29, 0.0  ;;  %v1037_v34 = vsel %vm830_vm8, %v1817_v43, 0.0 }
 0x21a   : > { %1100 = vrot.lane.b32.xlu1 %v2855_v63, %s2372_s27 }
 0x21b   : > { %1102 = vrot.lane.b32.xlu0 %v2858_v2, %s2372_s27  ;;  %v970_v48 = vcombine.low %v1818_v39, %v1819_v41  ;;  %s1809_s27 = sshll.u32 %s2613_s8, 1  ;;  %v1039_v41 = vadd.f32 %v1038_v31, %v1037_v34 }
 0x21c   : > { %s2909_s19 = scalar_lea.vmem [#allocation17], %s1809_s27  ;;  %s2380_s27 = smov [#allocation8]  }
 0x21d   : > { %v972_v50 = vsub.f32 %v1817_v43, %v970_v48 }
 0x21e   : > { %1116 = vrot.lane.b32.xlu1 %v2855_v63, %s2374_s20 }
 0x21f   : > { %1118 = vrot.lane.b32.xlu0 %v2858_v2, %s2374_s20  ;;  %v974_v51 = vcombine.high %v972_v50, %v972_v50  ;;  %v976_v44 = vsel %vm830_vm8, %v972_v50, 0.0  ;;  %1255 = vst [vmem:[%s3356_s29] sm:$0xff] %v972_v50  ;;  %s2058_s20 = sshll.u32 %s2380_s27, 4  ;;  %s2059_s20 = int_to_ptr.vmem [resolvable:$false] %s2058_s20 }
 0x220   : > { %v977_v53 = vrot.slane %v976_v44, 4 }
 0x221   : > { %v983_v54 = vsel %vm830_vm8, %v974_v51, 0.0 }
 0x222   : > { %1132 = vrot.lane.b32.xlu1 %v2855_v63, %s2377_s18  ;;  %v978_v56 = vadd.f32 %v977_v53, %v976_v44  ;;  %v984_v57 = vrot.slane %v983_v54, 4  ;;  %v991_v8 = vadd.f32 %v983_v54, %v976_v44 }
 0x223   : > { %1134 = vrot.lane.b32.xlu0 %v2858_v2, %s2377_s18  ;;  %s1363_s18 = sshll.u32 %s588_s0, 4  ;;  %s2060_s0 = scalar_lea.vmem %s2059_s20, 256  ;;  %s3000_s18 = int_to_ptr.vmem [resolvable:$true] %s1363_s18 }
 0x224   : > { %v979_v58 = vrot.slane %v978_v56, 2  ;;  %v985_v59 = vadd.f32 %v984_v57, %v983_v54  ;;  %s2054_s1 = scalar_lea.vmem %s3000_s18, 128  ;;  %p2061_p13 = scmp.lt.s32.totalorder %s3000_s18, %s2059_s20 }
 0x225   : > { %p2055_p6 = scmp.ne.s32.totalorder %s3000_s18, %s2054_s1  ;;  %p2062_p3 = scmp.lt.s32.totalorder %s2060_s0, %s2054_s1 }
 0x226   : > { %1124 = vrot.lane.b32.xlu1 %v2855_v63, %s2375_s16  ;;  %v980_v62 = vadd.f32 %v979_v58, %v978_v56  ;;  %v986_v1 = vrot.slane %v985_v59, 2 }
 0x227   : > { %1126 = vrot.lane.b32.xlu0 %v2858_v2, %s2375_s16  ;;  %p2056_p8 = pnand %p2055_p6, %p2568_p12  ;;  %p2063_p7 = por %p2062_p3, %p2061_p13 }
 0x228   : > { %v981_v0 = vrot.slane %v980_v62, 1  ;;  %v987_v18 = vadd.f32 %v986_v1, %v985_v59 }
 0x229   : > { %p2057_p10 = pneg %p2056_p8 }
 0x22a   : > { %1140 = vrot.lane.b32.xlu1 %v2855_v63, %s3392_s14  ;;  %v988_v52 = vrot.slane %v987_v18, 1  ;;  %v982_v20 = vadd.f32 %v981_v0, %v980_v62 }
 0x22b   : > { %1142 = vrot.lane.b32.xlu0 %v2858_v2, %s3392_s14  ;;  %s2990_s14 = sshll.u32 %s2496_s25, 7  ;;  %p2064_p9 = pnand %p2063_p7, %p2057_p10 }
 0x22c   : > { %v989_v55 = vadd.f32 %v988_v52, %v987_v18  ;;  %v1019_v27 = vmul.f32 %v1012_v49, %v982_v20  ;;  %v995_v39 = vsel %vm994_vm9, %v982_v20, 0.0  ;;  %s2996_s16 = scalar_lea.hbm %s3327_s9, %s2990_s14  ;;  %s3006_s17 = scalar_lea.hbm %s3329_s11, %s2990_s14 }
 0x22e   : > { %v1274_v10 = vcombine.low %v982_v20, %v989_v55  ;;  %v1020_v26 = vmul.f32 %v1016_v23, %v989_v55  ;;  %v1021_v30 = vsel %vm994_vm9, %v1019_v27, 0.0  ;;  %v996_v32 = vsel %vm994_vm9, %v989_v55, 0.0 }
 0x22f   : > { %v997_v48 = vadd.f32 %v996_v32, %v995_v39 }
 0x230   : > { %v1281_v11 = vrot.slane %v1274_v10, %v1280_v21  ;;  %v1022_v28 = vsel %vm994_vm9, %v1020_v26, 0.0 }
 0x231   : > { %v1023_v5 = vadd.f32 %v1022_v28, %v1021_v30 }
 0x232   : > { %v1288_v47 = vrot.slane %v1281_v11, %v1280_v21 }
 0x234   : > { %1294 = vst.msk [vmem:[%s2909_s19] sm:$0x3] %vm1292_vm15, %v1288_v47 }
 0x24a   : > { %1024 = vadd.xlane.f32.xlu0 %v1023_v5 }
 0x24e   : > { %1040 = vadd.xlane.f32.xlu0 %v1039_v41  ;;  %998 = vadd.xlane.f32.xlu1 %v997_v48 }
 0x252   : > { %992 = vadd.xlane.f32.xlu0 %v991_v8  ;;  %1054 = vmax.xlane.f32.xlu1 %v1053_v42 }
 0x263   : > { %1190 = vperm.xlu1 %1977, %v1187_v9  }
 0x280   : > { %v1093_v50 = vpop.permute.xlu1 %1092 }
 0x281   : > { %v1095_v51 = vpop.permute.xlu0 %1094 }
 0x282   : > { %v1096_v56 = vsel %vm682_vm0, %v1093_v50, %v1095_v51  ;;  %v1097_v44 = vsel %vm682_vm0, %v1095_v51, %v1093_v50  ;;  %vm1197_vm0 = vcmask 1041408  }
 0x283   : > { %v1098_v57 = vmul.f32 %v1097_v44, %v2687_v14  ;;  %v1099_v58 = vmul.f32 %v1096_v56, %v2699_v17 }
 0x284   : > { %v1109_v53 = vpop.permute.xlu1 %1108 }
 0x285   : > { %v1111_v43 = vpop.permute.xlu0 %1110  ;;  %v1150_v52 = vrot.slane %v1098_v57, 4  ;;  %v1151_v14 = vrot.slane %v1099_v58, 4  ;;  %v1186_v58 = vld [vmem:[%s3394_s6] sm:$0x3] }
 0x286   : > { %v1112_v54 = vsel %vm716_vm3, %v1109_v53, %v1111_v43  ;;  %v1113_v33 = vsel %vm716_vm3, %v1111_v43, %v1109_v53 }
 0x287   : > { %v1114_v61 = vmul.f32 %v1113_v33, %v2725_v37  ;;  %v1115_v62 = vmul.f32 %v1112_v54, %v2728_v38 }
 0x288   : > { %v1085_v40 = vpop.permute.xlu1 %1084 }
 0x289   : > { %v1087_v42 = vpop.permute.xlu0 %1086  ;;  %v1156_v55 = vrot.slane %v1114_v61, 4  ;;  %v1157_v21 = vrot.slane %v1115_v62, 4 }
 0x28a   : > { %v1088_v59 = vsel %vm665_vm1, %v1085_v40, %v1087_v42  ;;  %v1089_v60 = vsel %vm665_vm1, %v1087_v42, %v1085_v40  ;;  %vm1193_vm1 = vcmask 293888  }
 0x28b   : > { %v1090_v0 = vmul.f32 %v1089_v60, %v2691_v15  ;;  %v1091_v18 = vmul.f32 %v1088_v59, %v2695_v16 }
 0x28c   : > { %v1101_v1 = vpop.permute.xlu1 %1100 }
 0x28d   : > { %v1103_v19 = vpop.permute.xlu0 %1102  ;;  %v1173_v15 = vsel %vm830_vm8, %v1091_v18, %v1151_v14  ;;  %v1172_v47 = vsel %vm830_vm8, %v1090_v0, %v1150_v52 }
 0x28e   : > { %v1104_v17 = vsel %vm699_vm2, %v1101_v1, %v1103_v19  ;;  %v1105_v20 = vsel %vm699_vm2, %v1103_v19, %v1101_v1 }
 0x28f   : > { %v1106_v37 = vmul.f32 %v1105_v20, %v2719_v35  ;;  %v1107_v38 = vmul.f32 %v1104_v17, %v2722_v36 }
 0x290   : > { %v1117_v10 = vpop.permute.xlu1 %1116 }
 0x291   : > { %v1119_v11 = vpop.permute.xlu0 %1118  ;;  %v1175_v16 = vsel %vm830_vm8, %v1107_v38, %v1157_v21  ;;  %v1174_v22 = vsel %vm830_vm8, %v1106_v37, %v1156_v55 }
 0x292   : > { %v1120_v23 = vsel %vm733_vm4, %v1117_v10, %v1119_v11  ;;  %v1121_v49 = vsel %vm733_vm4, %v1119_v11, %v1117_v10  ;;  %v1181_v26 = vpack.c.bf16 %v1175_v16, %v1173_v15  ;;  %v1180_v35 = vpack.c.bf16 %v1174_v22, %v1172_v47 }
 0x293   : > { %v1122_v27 = vmul.f32 %v1120_v23, %v2740_v45  ;;  %v1123_v28 = vmul.f32 %v1121_v49, %v2743_v46 }
 0x294   : > { %1204 = vmatprep.subr.bf16.mxu1 %v1181_v26  ;;  %v1133_v36 = vpop.permute.xlu1 %1132 }
 0x295   : > { %v1135_v29 = vpop.permute.xlu0 %1134  ;;  %1205 = vmatpush1.bf16.msra.mxu1 %v1180_v35  ;;  %v1162_v39 = vrot.slane %v1122_v27, 4  ;;  %v1163_v41 = vrot.slane %v1123_v28, 4 }
 0x296   : > { %v1136_v30 = vsel %vm767_vm6, %v1133_v36, %v1135_v29  ;;  %v1137_v5 = vsel %vm767_vm6, %v1135_v29, %v1133_v36 }
 0x297   : > { %v1138_v31 = vmul.f32 %v1136_v30, %v2768_v12  ;;  %v1139_v32 = vmul.f32 %v1137_v5, %v2771_v13  ;;  %v1177_v13 = vsel %vm830_vm8, %v2858_v2, %v1163_v41  ;;  %v1176_v56 = vsel %vm830_vm8, %v2855_v63, %v1162_v39 }
 0x298   : > { %v1125_v34 = vpop.permute.xlu1 %1124 }
 0x299   : > { %v1127_v48 = vpop.permute.xlu0 %1126  ;;  %v1168_v8 = vrot.slane %v1138_v31, 4  ;;  %v1169_v9 = vrot.slane %v1139_v32, 4 }
 0x29a   : > { %v1128_v45 = vsel %vm750_vm5, %v1125_v34, %v1127_v48  ;;  %v1129_v46 = vsel %vm750_vm5, %v1127_v48, %v1125_v34 }
 0x29b   : > { %v1130_v50 = vmul.f32 %v1128_v45, %v2761_v3  ;;  %v1131_v51 = vmul.f32 %v1129_v46, %v2764_v4 }
 0x29c   : > { %v1141_v53 = vpop.permute.xlu1 %1140 }
 0x29d   : > { %v1143_v12 = vpop.permute.xlu0 %1142  ;;  %v1179_v43 = vsel %vm830_vm8, %v1131_v51, %v1169_v9  ;;  %v1178_v44 = vsel %vm830_vm8, %v1130_v50, %v1168_v8 }
 0x29e   : > { %v1144_v54 = vsel %vm784_vm7, %v1141_v53, %v1143_v12  ;;  %v1145_v3 = vsel %vm784_vm7, %v1143_v12, %v1141_v53  ;;  %v1183_v33 = vpack.c.bf16 %v1179_v43, %v1177_v13  ;;  %v1182_v4 = vpack.c.bf16 %v1178_v44, %v1176_v56 }
 0x29f   : > { %v1146_v40 = vmul.f32 %v2786_v24, %v1144_v54  ;;  %v1147_v42 = vmul.f32 %v2788_v25, %v1145_v3 }
 0x2a0   : > { %1206 = vmatprep.subr.bf16.mxu1 %v1183_v33 }
 0x2a1   : > { %v1184_v2 = vpack.c.bf16 %v1146_v40, %v1146_v40  ;;  %v1185_v57 = vpack.c.bf16 %v1147_v42, %v1147_v42  ;;  %1207 = vmatpush1.bf16.msra.mxu1 %v1182_v4 }
 0x2a3   : > { %1820 = vmatprep.subr.msk.bf16.mxu1 %vm1197_vm0, %v1185_v57  ;;  %v1199_v63 = vsel %vm1197_vm0, %v1184_v2, 0 }
 0x2a5   : > { %1209 = vmatpush1.bf16.msra.mxu1 %v1199_v63 }
 0x2a8   : > { %1821 = vmatmul.mubr.msk.bf16.vlgmr.msra.gmra.mrb[0].mxu1 %vm1193_vm1, %v1186_v58 }
 0x2d7   : > { %v1025_v59 = vpop.xlane.xlu0 %1024 }
 0x2d8   : > { %v1026_v60 = vrot.slane %v1025_v59, 4 }
 0x2da   : > { %v1027_v61 = vadd.f32 %v1026_v60, %v1025_v59 }
 0x2db   : > { %v1041_v24 = vpop.xlane.xlu0 %1040  ;;  %v999_v62 = vpop.xlane.xlu1 %998 }
 0x2dc   : > { %v1028_v25 = vrot.slane %v1027_v61, 2  ;;  %v1042_v1 = vrot.slane %v1041_v24, 4  ;;  %v1000_v0 = vrot.slane %v999_v62, 4 }
 0x2de   : > { %v1043_v18 = vadd.f32 %v1042_v1, %v1041_v24  ;;  %v1001_v19 = vadd.f32 %v1000_v0, %v999_v62  ;;  %v1029_v14 = vadd.f32 %v1028_v25, %v1027_v61 }
 0x2df   : > { %v1055_v52 = vpop.xlane.xlu1 %1054 }
 0x2e0   : > { %v1044_v17 = vrot.slane %v1043_v18, 2  ;;  %v1002_v20 = vrot.slane %v1001_v19, 2  ;;  %v1056_v55 = vrot.slane %v1055_v52, 4  ;;  %v1030_v10 = vrot.slane %v1029_v14, 1 }
 0x2e2   : > { %v1057_v21 = vmax.f32 %v1055_v52, %v1056_v55  ;;  %v1003_v37 = vadd.f32 %v1002_v20, %v1001_v19  ;;  %v1045_v38 = vadd.f32 %v1044_v17, %v1043_v18  ;;  %v1031_v49 = vadd.f32 %v1030_v10, %v1029_v14 }
 0x2e4   : > { %v1058_v11 = vrot.slane %v1057_v21, 2  ;;  %v1004_v15 = vrot.slane %v1003_v37, 1  ;;  %v1046_v16 = vrot.slane %v1045_v38, 1 }
 0x2e6   : > { %v1005_v47 = vadd.f32 %v1004_v15, %v1003_v37  ;;  %v1047_v22 = vadd.f32 %v1046_v16, %v1045_v38  ;;  %v1059_v23 = vmax.f32 %v1057_v21, %v1058_v11 }
 0x2e8   : > { %1858 = vpush %v1005_v47  ;;  %v1060_v26 = vrot.slane %v1059_v23, 1 }
 0x2e9   : > { %1860 = vpush %v1031_v49 }
 0x2ea   : > { %1862 = vpush %v1047_v22  ;;  %v1061_v35 = vmax.f32 %v1059_v23, %v1060_v26 }
 0x2ec   : > { %1864 = vpush %v1061_v35 }
 0x2ed   : > { %2067 = shalt.err (!%p2064_p9)
}
 0x2ee   : > { %s2068_s21 = scalar_lea.hbm %s2996_s16, 128  ;;  %s2072_s27 = scalar_lea.hbm %s3327_s9, 256 }
 0x2ef   : > { %p2069_p2 = scmp.ne.s32.totalorder %s2996_s16, %s2068_s21  ;;  %p2073_p1 = scmp.lt.u32.totalorder %s2996_s16, %s3327_s9 }
 0x2f0   : > { %p2074_p11 = scmp.lt.u32.totalorder %s2072_s27, %s2068_s21  ;;  %p2076_p6 = scmp.lt.u32.totalorder %s2068_s21, %s2996_s16 }
 0x2f1   : > { %p2070_p5 = pnand %p2069_p2, %p2568_p12 }
 0x2f2   : > { %p2075_p4 = por %p2074_p11, %p2073_p1 }
 0x2f3   : > { %p2071_p0 = pneg %p2070_p5 }
 0x2f4   : > { %p2077_p8 = por %p2076_p6, %p2075_p4 }
 0x2f6   : > { %p2078_p10 = pnand %p2077_p8, %p2071_p0 }
 0x2f8   : > { %2081 = shalt.err (!%p2078_p10)
}
 0x2f9   : > { %s3395_s1 = scalar_lea.sflag [#allocation9], %s2987_s10  ;;  %vm1064_vm2 = vcmask 7168   ;;  %s3396_s2 = scalar_lea.vmem [#allocation11], %s2802_s12  ;;  %vm1066_vm3 = vcmask 15360   ;;  %vm1068_vm4 = vcmask 23552  }
 0x2fa   : > { %1873 = dma.vmem_to_hbm [thread:$0]  (%p2568_p12), %s3000_s18, 128, %s2996_s16, %s3395_s1  }
 0x2fb   : > { %s1391_s0 = sshll.u32 %s3396_s2, 4  ;;  %s3357_s16 = scalar_lea.sflag [#allocation12], %s2987_s10  ;;  %s3034_s0 = int_to_ptr.vmem [resolvable:$true] %s1391_s0 }
 0x2fc   : > { %s2082_s18 = scalar_lea.vmem %s3034_s0, 128  ;;  %s2381_s27 = smov [#allocation11]  }
 0x2fd   : > { %p2083_p13 = scmp.ne.s32.totalorder %s3034_s0, %s2082_s18  ;;  %s2086_s20 = sshll.u32 %s2381_s27, 4  ;;  %s2087_s20 = int_to_ptr.vmem [resolvable:$false] %s2086_s20 }
 0x2fe   : > { %s2088_s1 = scalar_lea.vmem %s2087_s20, 256  ;;  %p2089_p9 = scmp.lt.s32.totalorder %s3034_s0, %s2087_s20 }
 0x2ff   : > { %p2084_p3 = pnand %p2083_p13, %p2568_p12  ;;  %p2090_p2 = scmp.lt.s32.totalorder %s2088_s1, %s2082_s18 }
 0x301   : > { %p2085_p7 = pneg %p2084_p3  ;;  %p2091_p5 = por %p2090_p2, %p2089_p9 }
 0x303   : > { %p2092_p0 = pnand %p2091_p5, %p2085_p7 }
 0x319   : > { %s1859_s29 = spop %1858 }
 0x31a   : > { %v1007_v36 = vstv %s1859_s29  ;;  %s1861_s30 = spop %1860 }
 0x31b   : > { %v1033_v27 = vstv %s1861_s30  ;;  %s3036_s21 = spop %1862 }
 0x31c   : > { %v1065_v28 = vsel %vm1064_vm2, %v1007_v36, %v1033_v27  ;;  %v1049_v29 = vstv %s3036_s21 }
 0x31d   : > { %2095 = shalt.err (!%p2092_p0)
}
 0x31e   : > { %s2096_s29 = scalar_lea.hbm %s3006_s17, 128  ;;  %s2100_s21 = scalar_lea.hbm %s3329_s11, 256 }
 0x31f   : > { %p2097_p1 = scmp.ne.s32.totalorder %s3006_s17, %s2096_s29  ;;  %p2101_p6 = scmp.lt.u32.totalorder %s3006_s17, %s3329_s11 }
 0x320   : > { %p2102_p8 = scmp.lt.u32.totalorder %s2100_s21, %s2096_s29  ;;  %p2104_p13 = scmp.lt.u32.totalorder %s2096_s29, %s3006_s17 }
 0x321   : > { %p2098_p11 = pnand %p2097_p1, %p2568_p12 }
 0x322   : > { %p2103_p10 = por %p2102_p8, %p2101_p6 }
 0x323   : > { %p2099_p4 = pneg %p2098_p11 }
 0x324   : > { %p2105_p3 = por %p2104_p13, %p2103_p10 }
 0x326   : > { %p2106_p7 = pnand %p2105_p3, %p2099_p4 }
 0x328   : > { %2109 = shalt.err (!%p2106_p7)
}
 0x329   : > { %1875 = dma.vmem_to_hbm [thread:$0]  (%p2568_p12), %s3034_s0, 128, %s3006_s17, %s3357_s16   ;;  %v1067_v30 = vsel %vm1066_vm3, %v1065_v28, %v1049_v29 }
 0x32a   : > { %s1865_s18 = spop %1864  ;;  %s3067_s29 = scalar_lea.hbm %s3331_s13, %s2990_s14 }
 0x32b   : > { %v1063_v5 = vstv %s1865_s18  ;;  %s3397_s30 = scalar_lea.vmem [#allocation14], %s2802_s12  ;;  %s2382_s17 = smov 4  }
 0x32c   : > { %s1419_s21 = sshll.u32 %s3397_s30, 4  ;;  %v1069_v31 = vsel %vm1068_vm4, %v1067_v30, %v1063_v5  ;;  %s3358_s0 = scalar_lea.sflag [#allocation15], %s2987_s10  ;;  %s3073_s21 = int_to_ptr.vmem [resolvable:$true] %s1419_s21 }
 0x32d   : > { %1077 = vrot.lane.b32.xlu0 %v1069_v31, %s2382_s17  ;;  %s2110_s20 = scalar_lea.vmem %s3073_s21, 128  ;;  %s2383_s1 = smov [#allocation14]  }
 0x32e   : > { %p2111_p9 = scmp.ne.s32.totalorder %s3073_s21, %s2110_s20  ;;  %s2114_s18 = sshll.u32 %s2383_s1, 4  ;;  %s2115_s18 = int_to_ptr.vmem [resolvable:$false] %s2114_s18 }
 0x32f   : > { %s2116_s2 = scalar_lea.vmem %s2115_s18, 256  ;;  %p2117_p0 = scmp.lt.s32.totalorder %s3073_s21, %s2115_s18 }
 0x330   : > { %p2112_p2 = pnand %p2111_p9, %p2568_p12  ;;  %p2118_p1 = scmp.lt.s32.totalorder %s2116_s2, %s2110_s20 }
 0x332   : > { %p2113_p5 = pneg %p2112_p2  ;;  %p2119_p11 = por %p2118_p1, %p2117_p0 }
 0x334   : > { %p2120_p4 = pnand %p2119_p11, %p2113_p5 }
 0x336   : > { %2123 = shalt.err (!%p2120_p4)
}
 0x337   : > { %s2124_s30 = scalar_lea.hbm %s3067_s29, 128  ;;  %s2128_s1 = scalar_lea.hbm %s3331_s13, 256 }
 0x338   : > { %p2125_p6 = scmp.ne.s32.totalorder %s3067_s29, %s2124_s30  ;;  %p2129_p13 = scmp.lt.u32.totalorder %s3067_s29, %s3331_s13 }
 0x339   : > { %p2130_p3 = scmp.lt.u32.totalorder %s2128_s1, %s2124_s30  ;;  %p2132_p9 = scmp.lt.u32.totalorder %s2124_s30, %s3067_s29 }
 0x33a   : > { %p2126_p8 = pnand %p2125_p6, %p2568_p12 }
 0x33b   : > { %p2131_p7 = por %p2130_p3, %p2129_p13 }
 0x33c   : > { %p2127_p10 = pneg %p2126_p8 }
 0x33d   : > { %p2133_p2 = por %p2132_p9, %p2131_p7 }
 0x33f   : > { %p2134_p5 = pnand %p2133_p2, %p2127_p10 }
 0x341   : > { %2137 = shalt.err (!%p2134_p5)
}
 0x342   : > { %1877 = dma.vmem_to_hbm [thread:$0]  (%p2568_p12), %s3073_s21, 128, %s3067_s29, %s3358_s0  }
 0x343   : > { %s3398_s16 = sshll.u32 %s2496_s25, 5  ;;  %s3399_s2 = sld [smem:[#allocation41_spill]] }
 0x344   : > { %s1447_s30 = sshll.u32 %s2909_s19, 4  ;;  %s1331_s1 = scalar_lea.sflag [#allocation18], %s2987_s10  ;;  %s1448_s30 = int_to_ptr.vmem [resolvable:$true] %s1447_s30 }
 0x345   : > { %s2138_s18 = scalar_lea.vmem %s1448_s30, 32  ;;  %s2384_s3 = smov [#allocation17]  }
 0x346   : > { %p2139_p0 = scmp.ne.s32.totalorder %s1448_s30, %s2138_s18  ;;  %s2142_s4 = sshll.u32 %s2384_s3, 4  ;;  %s2143_s4 = int_to_ptr.vmem [resolvable:$false] %s2142_s4 }
 0x347   : > { %s2144_s5 = scalar_lea.vmem %s2143_s4, 64  ;;  %p2145_p4 = scmp.lt.s32.totalorder %s1448_s30, %s2143_s4 }
 0x348   : > { %p2140_p1 = pnand %p2139_p0, %p2568_p12  ;;  %p2146_p6 = scmp.lt.s32.totalorder %s2144_s5, %s2138_s18 }
 0x349   : > { %s3105_s17 = scalar_lea.hbm %s3399_s2, %s3398_s16 }
 0x34a   : > { %p2141_p11 = pneg %p2140_p1  ;;  %p2147_p8 = por %p2146_p6, %p2145_p4 }
 0x34c   : > { %p2148_p10 = pnand %p2147_p8, %p2141_p11 }
 0x34e   : > { %2151 = shalt.err (!%p2148_p10)
}
 0x34f   : > { %s2152_s19 = scalar_lea.hbm %s3105_s17, 32  ;;  %s2156_s3 = scalar_lea.hbm %s3399_s2, 64 }
 0x350   : > { %p2153_p13 = scmp.ne.s32.totalorder %s3105_s17, %s2152_s19  ;;  %p2157_p9 = scmp.lt.u32.totalorder %s3105_s17, %s3399_s2 }
 0x351   : > { %p2158_p2 = scmp.lt.u32.totalorder %s2156_s3, %s2152_s19  ;;  %p2160_p0 = scmp.lt.u32.totalorder %s2152_s19, %s3105_s17 }
 0x352   : > { %p2154_p3 = pnand %p2153_p13, %p2568_p12 }
 0x353   : > { %p2159_p5 = por %p2158_p2, %p2157_p9 }
 0x354   : > { %p2155_p7 = pneg %p2154_p3 }
 0x355   : > { %p2161_p1 = por %p2160_p0, %p2159_p5 }
 0x357   : > { %p2162_p11 = pnand %p2161_p1, %p2155_p7 }
 0x359   : > { %2165 = shalt.err (!%p2162_p11)
}
 0x35a   : > { %1879 = dma.vmem_to_hbm [thread:$0]  (%p2568_p12), %s1448_s30, 32, %s3105_s17, %s1331_s1  }
 0x35b   : > { %s3400_s20 = sld [smem:[#allocation38_spill]]  ;;  %s3401_s19 = scalar_lea.vmem [#allocation10], %s2802_s12 }
 0x35c   : > { %s1377_s29 = sshll.u32 %s3401_s19, 4  ;;  %s3402_s16 = sld [smem:[#allocation39_spill]]  ;;  %s1378_s29 = int_to_ptr.vmem [resolvable:$true] %s1377_s29 }
 0x35d   : > { %s3403_s0 = scalar_lea.vmem [#allocation13], %s2802_s12  ;;  %s2166_s6 = scalar_lea.vmem %s1378_s29, 128 }
 0x35e   : > { %s1405_s2 = sshll.u32 %s3403_s0, 4  ;;  %p2167_p4 = scmp.ne.s32.totalorder %s1378_s29, %s2166_s6  ;;  %s1406_s2 = int_to_ptr.vmem [resolvable:$true] %s1405_s2 }
 0x35f   : > { %s2385_s17 = smov [#allocation10]  }
 0x360   : > { %p2168_p6 = pnand %p2167_p4, %p2568_p12  ;;  %s2170_s30 = sshll.u32 %s2385_s17, 4  ;;  %s2171_s30 = int_to_ptr.vmem [resolvable:$false] %s2170_s30 }
 0x361   : > { %s3132_s18 = scalar_lea.hbm %s3400_s20, %s2990_s14  ;;  %s2172_s5 = scalar_lea.vmem %s2171_s30, 256 }
 0x362   : > { %s3140_s4 = scalar_lea.hbm %s3402_s16, %s2990_s14  ;;  %p2169_p8 = pneg %p2168_p6 }
 0x363   : > { %p2173_p10 = scmp.lt.s32.totalorder %s1378_s29, %s2171_s30  ;;  %p2174_p13 = scmp.lt.s32.totalorder %s2172_s5, %s2166_s6 }
 0x365   : > { %p2175_p3 = por %p2174_p13, %p2173_p10 }
 0x367   : > { %p2176_p7 = pnand %p2175_p3, %p2169_p8 }
 0x369   : > { %2179 = shalt.err (!%p2176_p7)
}
 0x36a   : > { %s2180_s0 = scalar_lea.hbm %s3132_s18, 128  ;;  %s2184_s21 = scalar_lea.hbm %s3400_s20, 256 }
 0x36b   : > { %p2181_p9 = scmp.ne.s32.totalorder %s3132_s18, %s2180_s0  ;;  %p2185_p0 = scmp.lt.u32.totalorder %s3132_s18, %s3400_s20 }
 0x36c   : > { %p2186_p1 = scmp.lt.u32.totalorder %s2184_s21, %s2180_s0  ;;  %p2188_p4 = scmp.lt.u32.totalorder %s2180_s0, %s3132_s18 }
 0x36d   : > { %p2182_p2 = pnand %p2181_p9, %p2568_p12 }
 0x36e   : > { %p2187_p11 = por %p2186_p1, %p2185_p0 }
 0x36f   : > { %p2183_p5 = pneg %p2182_p2 }
 0x370   : > { %p2189_p6 = por %p2188_p4, %p2187_p11 }
 0x372   : > { %p2190_p8 = pnand %p2189_p6, %p2183_p5 }
 0x374   : > { %2193 = shalt.err (!%p2190_p8)
}
 0x375   : > { %s3404_s6 = scalar_lea.sflag [#allocation9], %s2987_s10  ;;  %s3405_s27 = sld [smem:[#allocation40_spill]] }
 0x376   : > { %1874 = dma.vmem_to_hbm [thread:$0]  (%p2568_p12), %s1378_s29, 128, %s3132_s18, %s3404_s6  }
 0x377   : > { %s2194_s21 = scalar_lea.vmem %s1406_s2, 128  ;;  %s2386_s0 = smov [#allocation13]  }
 0x378   : > { %p2195_p10 = scmp.ne.s32.totalorder %s1406_s2, %s2194_s21  ;;  %s2198_s3 = sshll.u32 %s2386_s0, 4  ;;  %s2199_s3 = int_to_ptr.vmem [resolvable:$false] %s2198_s3 }
 0x379   : > { %s2200_s17 = scalar_lea.vmem %s2199_s3, 256  ;;  %p2201_p7 = scmp.lt.s32.totalorder %s1406_s2, %s2199_s3 }
 0x37a   : > { %p2196_p13 = pnand %p2195_p10, %p2568_p12  ;;  %p2202_p9 = scmp.lt.s32.totalorder %s2200_s17, %s2194_s21 }
 0x37b   : > { %s3167_s19 = scalar_lea.hbm %s3405_s27, %s2990_s14 }
 0x37c   : > { %p2197_p3 = pneg %p2196_p13  ;;  %p2203_p2 = por %p2202_p9, %p2201_p7 }
 0x37e   : > { %p2204_p5 = pnand %p2203_p2, %p2197_p3 }
 0x380   : > { %2207 = shalt.err (!%p2204_p5)
}
 0x381   : > { %s2208_s18 = scalar_lea.hbm %s3140_s4, 128  ;;  %s2212_s30 = scalar_lea.hbm %s3402_s16, 256 }
 0x382   : > { %p2209_p0 = scmp.ne.s32.totalorder %s3140_s4, %s2208_s18  ;;  %p2213_p4 = scmp.lt.u32.totalorder %s3140_s4, %s3402_s16 }
 0x383   : > { %p2214_p6 = scmp.lt.u32.totalorder %s2212_s30, %s2208_s18  ;;  %p2216_p10 = scmp.lt.u32.totalorder %s2208_s18, %s3140_s4 }
 0x384   : > { %p2210_p1 = pnand %p2209_p0, %p2568_p12 }
 0x385   : > { %p2215_p8 = por %p2214_p6, %p2213_p4 }
 0x386   : > { %p2211_p11 = pneg %p2210_p1 }
 0x387   : > { %p2217_p13 = por %p2216_p10, %p2215_p8 }
 0x389   : > { %p2218_p3 = pnand %p2217_p13, %p2211_p11 }
 0x38b   : > { %2221 = shalt.err (!%p2218_p3)
}
 0x38c   : > { %s3406_s21 = scalar_lea.sflag [#allocation12], %s2987_s10  ;;  %s3407_s3 = scalar_lea.vmem [#allocation16], %s2802_s12 }
 0x38d   : > { %1876 = dma.vmem_to_hbm [thread:$0]  (%p2568_p12), %s1406_s2, 128, %s3140_s4, %s3406_s21  }
 0x38e   : > { %s1433_s17 = sshll.u32 %s3407_s3, 4  ;;  %s2387_s18 = smov [#allocation16]   ;;  %s1434_s17 = int_to_ptr.vmem [resolvable:$true] %s1433_s17 }
 0x38f   : > { %s2222_s29 = scalar_lea.vmem %s1434_s17, 128  ;;  %s2226_s6 = sshll.u32 %s2387_s18, 4  ;;  %s2227_s6 = int_to_ptr.vmem [resolvable:$false] %s2226_s6 }
 0x390   : > { %p2223_p7 = scmp.ne.s32.totalorder %s1434_s17, %s2222_s29  ;;  %s2228_s30 = scalar_lea.vmem %s2227_s6, 256 }
 0x391   : > { %p2229_p5 = scmp.lt.s32.totalorder %s1434_s17, %s2227_s6  ;;  %p2230_p0 = scmp.lt.s32.totalorder %s2228_s30, %s2222_s29 }
 0x392   : > { %p2224_p9 = pnand %p2223_p7, %p2568_p12 }
 0x393   : > { %p2231_p1 = por %p2230_p0, %p2229_p5 }
 0x394   : > { %p2225_p2 = pneg %p2224_p9 }
 0x396   : > { %p2232_p11 = pnand %p2231_p1, %p2225_p2 }
 0x398   : > { %2235 = shalt.err (!%p2232_p11)
}
 0x399   : > { %s2236_s2 = scalar_lea.hbm %s3167_s19, 128  ;;  %s2240_s0 = scalar_lea.hbm %s3405_s27, 256 }
 0x39a   : > { %p2237_p4 = scmp.ne.s32.totalorder %s3167_s19, %s2236_s2  ;;  %p2241_p10 = scmp.lt.u32.totalorder %s3167_s19, %s3405_s27 }
 0x39b   : > { %p2242_p13 = scmp.lt.u32.totalorder %s2240_s0, %s2236_s2  ;;  %p2244_p7 = scmp.lt.u32.totalorder %s2236_s2, %s3167_s19 }
 0x39c   : > { %p2238_p6 = pnand %p2237_p4, %p2568_p12 }
 0x39d   : > { %p2243_p3 = por %p2242_p13, %p2241_p10 }
 0x39e   : > { %p2239_p8 = pneg %p2238_p6 }
 0x39f   : > { %p2245_p9 = por %p2244_p7, %p2243_p3 }
 0x3a1   : > { %p2246_p2 = pnand %p2245_p9, %p2239_p8 }
 0x3a3   : > { %2249 = shalt.err (!%p2246_p2)
}
 0x3a4   : > { %s3408_s29 = scalar_lea.sflag [#allocation15], %s2987_s10  ;;  %v1191_v32 = vpop.permute.xlu1 %1190  ;;  %v1238_v34 = vpop.f32.mrb[0].mxu1  ;;  %s581_s18 = scalar_lea.vmem [#allocation7], %s2802_s12 }
 0x3a5   : > { %1878 = dma.vmem_to_hbm [thread:$0]  (%p2568_p12), %s1434_s17, 128, %s3167_s19, %s3408_s29   ;;  %v1239_v39 = vadd.f32 %v1238_v34, %v1191_v32  ;;  %v1240_v41 = vpop.f32.mrb[1].mxu1 }
 0x3a6   : > { %s1349_s6 = sshll.u32 %s581_s18, 4  ;;  %v1241_v48 = vadd.f32 %v1240_v41, %v1191_v32  ;;  %v1242_v45 = vpop.f32.mrb[2].mxu1  ;;  %s3409_s4 = sld [smem:[#allocation37_spill]]  ;;  %s3216_s6 = int_to_ptr.vmem [resolvable:$true] %s1349_s6 }
 0x3a7   : > { %v1243_v46 = vpop.f32.mrb[3].mxu1  ;;  %s1296_s19 = scalar_lea.sflag [#allocation4], %s2613_s8  ;;  %s2250_s17 = scalar_lea.vmem %s3216_s6, 128 }
 0x3a8   : > { %v1247_v8 = vcombine.low %v1239_v39, %v1241_v48  ;;  %p2251_p5 = scmp.ne.s32.totalorder %s3216_s6, %s2250_s17  ;;  %s2388_s12 = smov [#allocation7]  }
 0x3a9   : > { %s2254_s0 = sshll.u32 %s2388_s12, 4  ;;  %s2255_s0 = int_to_ptr.vmem [resolvable:$false] %s2254_s0 }
 0x3aa   : > { %1249 = vst [vmem:[%s581_s18] sm:$0xff] %v1247_v8  ;;  %p2252_p0 = pnand %p2251_p5, %p2568_p12  ;;  %s2256_s21 = scalar_lea.vmem %s2255_s0, 256 }
 0x3ab   : > { %p2257_p11 = scmp.lt.s32.totalorder %s3216_s6, %s2255_s0  ;;  %p2258_p4 = scmp.lt.s32.totalorder %s2256_s21, %s2250_s17 }
 0x3ac   : > { %s3214_s5 = scalar_lea.hbm %s3409_s4, %s2990_s14  ;;  %p2253_p1 = pneg %p2252_p0 }
 0x3ad   : > { %p2259_p6 = por %p2258_p4, %p2257_p11 }
 0x3af   : > { %p2260_p8 = pnand %p2259_p6, %p2253_p1 }
 0x3b1   : > { %2263 = shalt.err (!%p2260_p8)
}
 0x3b2   : > { %s2264_s14 = scalar_lea.hbm %s3214_s5, 128  ;;  %s2268_s18 = scalar_lea.hbm %s3409_s4, 256 }
 0x3b3   : > { %p2265_p10 = scmp.ne.s32.totalorder %s3214_s5, %s2264_s14  ;;  %p2269_p7 = scmp.lt.u32.totalorder %s3214_s5, %s3409_s4 }
 0x3b4   : > { %p2270_p9 = scmp.lt.u32.totalorder %s2268_s18, %s2264_s14  ;;  %p2272_p5 = scmp.lt.u32.totalorder %s2264_s14, %s3214_s5 }
 0x3b5   : > { %p2266_p13 = pnand %p2265_p10, %p2568_p12 }
 0x3b6   : > { %p2271_p2 = por %p2270_p9, %p2269_p7 }
 0x3b7   : > { %p2267_p3 = pneg %p2266_p13 }
 0x3b8   : > { %p2273_p0 = por %p2272_p5, %p2271_p2 }
 0x3ba   : > { %p2274_p1 = pnand %p2273_p0, %p2267_p3 }
 0x3bc   : > { %2277 = shalt.err (!%p2274_p1)
}
 0x3bd   : > { %1872 = dma.vmem_to_hbm [thread:$0]  (%p2568_p12), %s3216_s6, 128, %s3214_s5, %s1296_s19   ;;  %v1073_v9 = vsub.s32 %v2671_v7, %v2668_v6  ;;  %v993_v50 = vpop.xlane.xlu0 %992  ;;  %vm1080_vm5 = vcmask 31744   ;;  %vm1082_vm6 = vcmask 57344  }
 0x3be   : > { %s1846_s17 = sshll.u32 %s2496_s25, 4  ;;  %s636_s12 = scalar_lea.vmem [#allocation19], %s2613_s8 }
 0x3bf   : > { %s1460_s0 = sshll.u32 %s636_s12, 4  ;;  %v1074_v51 = vrot.slane %v993_v50, %v1073_v9  ;;  %s3410_s3 = sld [smem:[#allocation42_spill]]  ;;  %s3249_s0 = int_to_ptr.vmem [resolvable:$true] %s1460_s0 }
 0x3c0   : > { %s2278_s6 = scalar_lea.vmem %s3249_s0, 16  ;;  %s2389_s25 = smov [#allocation19]  }
 0x3c1   : > { %v1078_v53 = vpop.permute.xlu0 %1077  ;;  %p2279_p11 = scmp.ne.s32.totalorder %s3249_s0, %s2278_s6  ;;  %s2282_s8 = sshll.u32 %s2389_s25, 4  ;;  %s2283_s8 = int_to_ptr.vmem [resolvable:$false] %s2282_s8 }
 0x3c2   : > { %v1081_v12 = vsel %vm1080_vm5, %v1074_v51, %v1078_v53  ;;  %s2284_s5 = scalar_lea.vmem %s2283_s8, 32  ;;  %p2285_p8 = scmp.lt.s32.totalorder %s3249_s0, %s2283_s8 }
 0x3c3   : > { %1083 = vst.msk [vmem:[%s636_s12] sm:$0x1] %vm1082_vm6, %v1081_v12  ;;  %p2280_p4 = pnand %p2279_p11, %p2568_p12  ;;  %p2286_p10 = scmp.lt.s32.totalorder %s2284_s5, %s2278_s6 }
 0x3c5   : > { %s3247_s29 = scalar_lea.hbm %s3410_s3, %s1846_s17  ;;  %p2281_p6 = pneg %p2280_p4 }
 0x3c6   : > { %p2287_p13 = por %p2286_p10, %p2285_p8 }
 0x3c8   : > { %p2288_p3 = pnand %p2287_p13, %p2281_p6 }
 0x3ca   : > { %2291 = shalt.err (!%p2288_p3)
}
 0x3cb   : > { %s2292_s19 = scalar_lea.hbm %s3247_s29, 16  ;;  %s2296_s2 = scalar_lea.hbm %s3410_s3, 32 }
 0x3cc   : > { %p2293_p7 = scmp.ne.s32.totalorder %s3247_s29, %s2292_s19  ;;  %p2297_p5 = scmp.lt.u32.totalorder %s3247_s29, %s3410_s3 }
 0x3cd   : > { %p2298_p0 = scmp.lt.u32.totalorder %s2296_s2, %s2292_s19  ;;  %p2300_p11 = scmp.lt.u32.totalorder %s2292_s19, %s3247_s29 }
 0x3ce   : > { %p2294_p9 = pnand %p2293_p7, %p2568_p12 }
 0x3cf   : > { %p2299_p1 = por %p2298_p0, %p2297_p5 }
 0x3d0   : > { %p2295_p2 = pneg %p2294_p9 }
 0x3d1   : > { %p2301_p4 = por %p2300_p11, %p2299_p1 }
 0x3d3   : > { %p2302_p6 = pnand %p2301_p4, %p2295_p2 }
 0x3d5   : > { %2305 = shalt.err (!%p2302_p6)
}
 0x3d6   : > { %1880 = dma.vmem_to_hbm [thread:$0]  (%p2568_p12), %s3249_s0, 16, %s3247_s29, %s1331_s1  }
 0x3d7 PF: > { %s3411_s21 = sld [smem:[#allocation27_spill]]  ;;  %s3412_s14 = sld [smem:[#allocation28_spill]] }
 0x3d8   : > { %p3414_p10 = scmp.ge.s32.totalorder %s2364_s24, 2 }
 0x3dd   : > { %s1472_s6 = sand.u32 1, %s3411_s21   ;;  %p3413_p8 = scmp.ne.s32.totalorder %s3412_s14, 0 }
 0x3de   : > { %s1473_s8 = scalar_lea.sflag [#allocation4], %s1472_s6 }
 0x3df   : > { %p3279_p13 = pnand %p3414_p10, %p3413_p8 }
 0x3e1   : > { %2331 = dma.done.wait (!%p3279_p13), %s1473_s8, 128  }
 0x3e2   : > { %2333 = vsyncadd (!%p3279_p13), %s1473_s8, 4294967168  ;;  %s3416_s28 = sadd.s32 4294967294, %s2364_s24  }
 0x3e3   : > { %s1481_s10 = sand.u32 1, %s3416_s28  }
 0x3e4   : > { %s1482_s1 = scalar_lea.sflag [#allocation9], %s1481_s10 }
 0x3e5   : > { %2335 = dma.done.wait (!%p3279_p13), %s1482_s1, 256  }
 0x3e6   : > { %2337 = vsyncadd (!%p3279_p13), %s1482_s1, 4294967040  ;;  %s1500_s0 = scalar_lea.sflag [#allocation12], %s1481_s10 }
 0x3e7   : > { %2339 = dma.done.wait (!%p3279_p13), %s1500_s0, 256  }
 0x3e8   : > { %2341 = vsyncadd (!%p3279_p13), %s1500_s0, 4294967040  ;;  %s1518_s29 = scalar_lea.sflag [#allocation15], %s1481_s10 }
 0x3e9   : > { %2343 = dma.done.wait (!%p3279_p13), %s1518_s29, 256  }
 0x3ea   : > { %2345 = vsyncadd (!%p3279_p13), %s1518_s29, 4294967040  ;;  %s1536_s24 = scalar_lea.sflag [#allocation18], %s1481_s10 }
 0x3eb   : > { %2347 = dma.done.wait (!%p3279_p13), %s1536_s24, 48  }
 0x3ec   : > { %2349 = vsyncadd (!%p3279_p13), %s1536_s24, 4294967248  ;;  %s3417_s24 = sld [smem:[#allocation29_spill]]  ;;  %s3418_s21 = smov %s2356_s22 }
 0x3ed   : > { %s3419_s22 = smov %s2360_s23  ;;  %s3420_s23 = smov %s2564_s26 }
 0x3f2   : > { %p43_p12 = scmp.ge.s32.totalorder %s3417_s24, 4  }
 0x3f4   :  { %45 = sbr.rel (!%p43_p12) target bundleno = 28 (0x1c), region = 232 }
 0x3fb   :  { %1549 = vsyncpa [#allocation3], 1 }
 0x3fc   :  { %1551 = vsyncpa [#allocation3 + $0x1], 1 }
 0x3fd   :  { %1552 = vsyncpa [#allocation6], 1 }
 0x3fe   :  { %1553 = vsyncpa [#allocation4], 1 }
 0x3ff   :  { %1555 = vsyncpa [#allocation4 + $0x1], 1 }
 0x400   :  { %1556 = vsyncpa [#allocation9], 1 }
 0x401   :  { %1558 = vsyncpa [#allocation9 + $0x1], 1 }
 0x402   :  { %1559 = vsyncpa [#allocation12], 1 }
 0x403   :  { %1561 = vsyncpa [#allocation12 + $0x1], 1 }
 0x404   :  { %1562 = vsyncpa [#allocation15], 1 }
 0x405   :  { %1564 = vsyncpa [#allocation15 + $0x1], 1 }
 0x406   :  { %1565 = vsyncpa [#allocation18], 1 }
 0x407   :  { %1567 = vsyncpa [#allocation18 + $0x1], 1 }

</bundles_post_ra>
